<compile_context>
chip_gen: v7x
topology: tpu7x:2x2x1
jax: 0.10.0
libtpu: 0.0.40
codegen_flags: <defaults>
</compile_context>

<pallas_src>
import jax
import jax.numpy as jnp
from jax.experimental import pallas as pl
from jax.experimental.pallas import tpu as pltpu

_LANE = 128
_SUBLANE = 8
_SQRT1_2 = 0.7071067811865476


def _round_up(x, m):
    return ((x + m - 1) // m) * m


def mlp_kernel(x_ref, w1_ref, b1_ref, w2_ref, b2_ref, o_ref, acc_ref):
    j = pl.program_id(1)  # hidden-dim (reduction) axis

    @pl.when(j == 0)
    def _():
        acc_ref[...] = jnp.zeros_like(acc_ref)

    x = x_ref[...]                                              # (tile_n, Cin_p)
    # fc1 (f32 accumulation on the MXU) + bias, for this hidden-dim block.
    h = jnp.dot(x, w1_ref[...], preferred_element_type=jnp.float32) + b1_ref[...]
    # Exact GELU (erf formulation == PyTorch nn.GELU default), computed in f32.
    h = 0.5 * h * (1.0 + jax.lax.erf(h * _SQRT1_2))
    # dropout(p=0.0) -> identity
    # Partial fc2: accumulate this hidden block's contribution in f32.
    w2 = w2_ref[...]
    acc_ref[...] += jnp.dot(h.astype(w2.dtype), w2, preferred_element_type=jnp.float32)

    @pl.when(j == pl.num_programs(1) - 1)
    def _():
        o_ref[...] = (acc_ref[...] + b2_ref[...]).astype(o_ref.dtype)


def mlp_pallas(x, w1, b1, w2, b2, *, tile_n=256, tile_h=512):
    """x: [N, C_in]; w1: [C_in, H]; b1: [H]; w2: [H, C_out]; b2: [C_out]."""
    N, C_in = x.shape
    H = w1.shape[1]
    C_out = w2.shape[1]
    assert w1.shape == (C_in, H) and w2.shape == (H, C_out)
    assert b1.shape == (H,) and b2.shape == (C_out,)

    # --- lane-dense padding: every channel dim -> multiple of 128 (zero pad, exact) ---
    cin_p = _round_up(C_in, _LANE)
    cout_p = _round_up(C_out, _LANE)
    h_p = _round_up(H, _LANE)

    # Hidden-dim tiling: single block if it fits, else a trailing reduction grid axis.
    if h_p <= tile_h:
        tile_h = h_p
    else:
        tile_h = _round_up(tile_h, _LANE)
        h_p = _round_up(h_p, tile_h)
    grid_h = h_p // tile_h

    # Row tiling: fill the MXU M dimension; pad N up to a tile multiple.
    tile_n = max(_SUBLANE, min(tile_n, _round_up(N, _LANE)))
    tile_n = _round_up(tile_n, _SUBLANE)
    n_p = _round_up(N, tile_n)
    grid_n = n_p // tile_n

    x_dt = x.dtype
    w_dt = w1.dtype
    x_p = jnp.zeros((n_p, cin_p), x_dt).at[:N, :C_in].set(x)
    w1_p = jnp.zeros((cin_p, h_p), w_dt).at[:C_in, :H].set(w1)
    w2_p = jnp.zeros((h_p, cout_p), w_dt).at[:H, :C_out].set(w2)
    # Biases kept in f32: bias-add and GELU happen in f32 regardless of input dtype.
    b1_p = jnp.zeros((1, h_p), jnp.float32).at[0, :H].set(b1.astype(jnp.float32))
    b2_p = jnp.zeros((1, cout_p), jnp.float32).at[0, :C_out].set(b2.astype(jnp.float32))

    # VMEM budget -> explicit vmem_limit_bytes (headroom, capped at v7x's 64 MiB physical).
    x_bytes = jnp.dtype(x_dt).itemsize
    w_bytes = jnp.dtype(w_dt).itemsize
    weight_bufs = 1 if grid_h == 1 else 2
    budget = (
        2 * tile_n * cin_p * x_bytes                              # x tile (double-buffered)
        + 2 * tile_n * cout_p * x_bytes                           # out tile (double-buffered)
        + weight_bufs * (cin_p * tile_h + tile_h * cout_p) * w_bytes
        + weight_bufs * (tile_h + cout_p) * 4                     # biases (f32)
        + tile_n * cout_p * 4                                     # f32 accumulator scratch
        + 2 * tile_n * tile_h * 4                                 # f32 intermediates headroom
    )
    vmem_limit = int(min(max(2 * budget + (8 << 20), 32 << 20), 64 << 20))

    # Grid-invariant weights/biases (only when the hidden dim is a single block) can be
    # single-buffered to halve their VMEM footprint.
    w_mode = pl.Buffered(1) if grid_h == 1 else None

    def build(weight_pipeline_mode):
        return pl.pallas_call(
            mlp_kernel,
            out_shape=jax.ShapeDtypeStruct((n_p, cout_p), x_dt),
            grid_spec=pltpu.PrefetchScalarGridSpec(
                num_scalar_prefetch=0,
                grid=(grid_n, grid_h),                            # reduction (hidden) axis last
                in_specs=[
                    pl.BlockSpec((tile_n, cin_p), lambda i, j: (i, 0)),        # x tile
                    pl.BlockSpec((cin_p, tile_h), lambda i, j: (0, j),         # w1 block
                                 pipeline_mode=weight_pipeline_mode),
                    pl.BlockSpec((1, tile_h), lambda i, j: (0, j),             # b1 block
                                 pipeline_mode=weight_pipeline_mode),
                    pl.BlockSpec((tile_h, cout_p), lambda i, j: (j, 0),        # w2 block
                                 pipeline_mode=weight_pipeline_mode),
                    pl.BlockSpec((1, cout_p), lambda i, j: (0, 0),             # b2
                                 pipeline_mode=weight_pipeline_mode),
                ],
                out_specs=pl.BlockSpec((tile_n, cout_p), lambda i, j: (i, 0)),
                scratch_shapes=[pltpu.VMEM((tile_n, cout_p), jnp.float32)],
            ),
            compiler_params=pltpu.CompilerParams(
                dimension_semantics=("parallel", "arbitrary"),
                vmem_limit_bytes=vmem_limit,
            ),
        )

    try:
        out_p = build(w_mode)(x_p, w1_p, b1_p, w2_p, b2_p)
    except Exception:
        # Fallback: default double-buffered pipelining if pl.Buffered(1) is unsupported here.
        out_p = build(None)(x_p, w1_p, b1_p, w2_p, b2_p)

    return out_p[:N, :C_out]


def mlp_reference(x, w1, b1, w2, b2):
    h = x @ w1 + b1
    h = 0.5 * h * (1.0 + jax.lax.erf(h / jnp.sqrt(2.0).astype(h.dtype)))
    return h @ w2 + b2


if __name__ == "__main__":
    key = jax.random.PRNGKey(0)
    # Small MLP-block-like shapes: N points, hidden = 2 * in_channels.
    N, C_in, H, C_out = 384, 32, 64, 32

    kx, k1, kb1, k2, kb2 = jax.random.split(key, 5)
    x = jax.random.normal(kx, (N, C_in), dtype=jnp.float32)
    # Deterministic "nn.Linear-like" init (uniform in +/- 1/sqrt(fan_in)).
    w1 = jax.random.uniform(k1, (C_in, H), dtype=jnp.float32,
                            minval=-1.0, maxval=1.0) / jnp.sqrt(C_in)
    b1 = jax.random.uniform(kb1, (H,), dtype=jnp.float32,
                            minval=-1.0, maxval=1.0) / jnp.sqrt(C_in)
    w2 = jax.random.uniform(k2, (H, C_out), dtype=jnp.float32,
                            minval=-1.0, maxval=1.0) / jnp.sqrt(H)
    b2 = jax.random.uniform(kb2, (C_out,), dtype=jnp.float32,
                            minval=-1.0, maxval=1.0) / jnp.sqrt(H)

    out = mlp_pallas(x, w1, b1, w2, b2)
    out = jax.block_until_ready(out)

    ref = mlp_reference(x, w1, b1, w2, b2)
    assert out.shape == (N, C_out)
    assert jnp.allclose(out, ref, atol=1e-3, rtol=1e-3), "mismatch vs reference"

    print("KERNEL_OK")
</pallas_src>

<mosaic_0001>
module attributes {stable_mosaic.version = 11 : i64} {
  func.func @mlp_kernel(%arg0: i32, %arg1: i32, %arg2: memref<256x128xf32, #tpu.memory_space<vmem>>, %arg3: memref<128x128xf32, #tpu.memory_space<vmem>>, %arg4: memref<1x128xf32, #tpu.memory_space<vmem>>, %arg5: memref<128x128xf32, #tpu.memory_space<vmem>>, %arg6: memref<1x128xf32, #tpu.memory_space<vmem>>, %arg7: memref<256x128xf32, #tpu.memory_space<vmem>>, %arg8: memref<256x128xf32, #tpu.memory_space<vmem>>) attributes {dimension_semantics = [#tpu.dimension_semantics<parallel>, #tpu.dimension_semantics<arbitrary>], iteration_bounds = array<i64: 2, 1>, scalar_prefetch = 0 : i64, scratch_operands = 1 : i64, tpu.core_type = #tpu.core_type<tc>, window_params = [{transform_indices = @transform_0, window_bounds = array<i64: 256, 128>}, {pipeline_mode = #tpu.pipeline_mode<synchronous>, transform_indices = @transform_1, window_bounds = array<i64: 128, 128>}, {pipeline_mode = #tpu.pipeline_mode<synchronous>, transform_indices = @transform_2, window_bounds = array<i64: 1, 128>}, {pipeline_mode = #tpu.pipeline_mode<synchronous>, transform_indices = @transform_3, window_bounds = array<i64: 128, 128>}, {pipeline_mode = #tpu.pipeline_mode<synchronous>, transform_indices = @transform_4, window_bounds = array<i64: 1, 128>}, {transform_indices = @transform_5, window_bounds = array<i64: 256, 128>}]} {
    %c0_i32 = arith.constant 0 : i32
    %0 = arith.cmpi eq, %arg1, %c0_i32 : i32
    %1 = arith.extui %0 : i1 to i32
    %c0_i32_0 = arith.constant 0 : i32
    %2 = arith.cmpi ne, %1, %c0_i32_0 : i32
    scf.if %2 {
      %cst_18 = arith.constant 0.000000e+00 : f32
      %25 = vector.broadcast %cst_18 : f32 to vector<256x128xf32>
      %c0_19 = arith.constant 0 : index
      %c0_20 = arith.constant 0 : index
      %26 = vector.load %arg8[%c0_19, %c0_20] : memref<256x128xf32, #tpu.memory_space<vmem>>, vector<256x128xf32>
      tpu.vector_store %arg8[%c0_19, %c0_20], %25 {strides = array<i32>} : memref<256x128xf32, #tpu.memory_space<vmem>>, vector<256x128xf32>,
    } else {
    }
    %c0 = arith.constant 0 : index
    %c0_1 = arith.constant 0 : index
    %3 = vector.load %arg2[%c0, %c0_1] : memref<256x128xf32, #tpu.memory_space<vmem>>, vector<256x128xf32>
    %c0_2 = arith.constant 0 : index
    %c0_3 = arith.constant 0 : index
    %4 = vector.load %arg3[%c0_2, %c0_3] : memref<128x128xf32, #tpu.memory_space<vmem>>, vector<128x128xf32>
    %cst = arith.constant dense<0.000000e+00> : vector<256x128xf32>
    %5 = tpu.matmul %3, %4, %cst {dimension_numbers = #tpu.dot_dimension_numbers<[1], [0], [0], [1], [0, 0, 1, 1], [], []>} : vector<256x128xf32>, vector<128x128xf32>, vector<256x128xf32> -> vector<256x128xf32>
    %c0_4 = arith.constant 0 : index
    %c0_5 = arith.constant 0 : index
    %6 = vector.load %arg4[%c0_4, %c0_5] : memref<1x128xf32, #tpu.memory_space<vmem>>, vector<1x128xf32>
    %7 = vector.broadcast %6 : vector<1x128xf32> to vector<256x128xf32>
    %8 = arith.addf %5, %7 : vector<256x128xf32>
    %cst_6 = arith.constant 5.000000e-01 : f32
    %9 = vector.broadcast %cst_6 : f32 to vector<256x128xf32>
    %10 = arith.mulf %9, %8 : vector<256x128xf32>
    %cst_7 = arith.constant 0.707106769 : f32
    %11 = vector.broadcast %cst_7 : f32 to vector<256x128xf32>
    %12 = arith.mulf %8, %11 : vector<256x128xf32>
    %13 = math.erf %12 : vector<256x128xf32>
    %cst_8 = arith.constant 1.000000e+00 : f32
    %14 = vector.broadcast %cst_8 : f32 to vector<256x128xf32>
    %15 = arith.addf %14, %13 : vector<256x128xf32>
    %16 = arith.mulf %10, %15 : vector<256x128xf32>
    %c0_9 = arith.constant 0 : index
    %c0_10 = arith.constant 0 : index
    %17 = vector.load %arg5[%c0_9, %c0_10] : memref<128x128xf32, #tpu.memory_space<vmem>>, vector<128x128xf32>
    %c0_11 = arith.constant 0 : index
    %c0_12 = arith.constant 0 : index
    %18 = vector.load %arg8[%c0_11, %c0_12] : memref<256x128xf32, #tpu.memory_space<vmem>>, vector<256x128xf32>
    %cst_13 = arith.constant dense<0.000000e+00> : vector<256x128xf32>
    %19 = tpu.matmul %16, %17, %cst_13 {dimension_numbers = #tpu.dot_dimension_numbers<[1], [0], [0], [1], [0, 0, 1, 1], [], []>} : vector<256x128xf32>, vector<128x128xf32>, vector<256x128xf32> -> vector<256x128xf32>
    %20 = arith.addf %18, %19 : vector<256x128xf32>
    %c0_14 = arith.constant 0 : index
    %c0_15 = arith.constant 0 : index
    %21 = vector.load %arg8[%c0_14, %c0_15] : memref<256x128xf32, #tpu.memory_space<vmem>>, vector<256x128xf32>
    tpu.vector_store %arg8[%c0_14, %c0_15], %20 {strides = array<i32>} : memref<256x128xf32, #tpu.memory_space<vmem>>, vector<256x128xf32>,
    %c0_i32_16 = arith.constant 0 : i32
    %22 = arith.cmpi eq, %arg1, %c0_i32_16 : i32
    %23 = arith.extui %22 : i1 to i32
    %c0_i32_17 = arith.constant 0 : i32
    %24 = arith.cmpi ne, %23, %c0_i32_17 : i32
    scf.if %24 {
      %c0_18 = arith.constant 0 : index
      %c0_19 = arith.constant 0 : index
      %25 = vector.load %arg8[%c0_18, %c0_19] : memref<256x128xf32, #tpu.memory_space<vmem>>, vector<256x128xf32>
      %c0_20 = arith.constant 0 : index
      %c0_21 = arith.constant 0 : index
      %26 = vector.load %arg6[%c0_20, %c0_21] : memref<1x128xf32, #tpu.memory_space<vmem>>, vector<1x128xf32>
      %27 = vector.broadcast %26 : vector<1x128xf32> to vector<256x128xf32>
      %28 = arith.addf %25, %27 : vector<256x128xf32>
      %c0_22 = arith.constant 0 : index
      %c0_23 = arith.constant 0 : index
      %29 = vector.load %arg7[%c0_22, %c0_23] : memref<256x128xf32, #tpu.memory_space<vmem>>, vector<256x128xf32>
      tpu.vector_store %arg7[%c0_22, %c0_23], %28 {strides = array<i32>} : memref<256x128xf32, #tpu.memory_space<vmem>>, vector<256x128xf32>,
    } else {
    }
    return
  }
  func.func @transform_0(%arg0: i32, %arg1: i32) -> (i32, i32) {
    %c0_i32 = arith.constant 0 : i32
    %c0_i32_0 = arith.constant 0 : i32
    return %arg0, %c0_i32 : i32, i32
  }
  func.func @transform_1(%arg0: i32, %arg1: i32) -> (i32, i32) {
    %c0_i32 = arith.constant 0 : i32
    %c0_i32_0 = arith.constant 0 : i32
    return %c0_i32, %arg1 : i32, i32
  }
  func.func @transform_2(%arg0: i32, %arg1: i32) -> (i32, i32) {
    %c0_i32 = arith.constant 0 : i32
    %c0_i32_0 = arith.constant 0 : i32
    return %c0_i32, %arg1 : i32, i32
  }
  func.func @transform_3(%arg0: i32, %arg1: i32) -> (i32, i32) {
    %c0_i32 = arith.constant 0 : i32
    %c0_i32_0 = arith.constant 0 : i32
    return %arg1, %c0_i32 : i32, i32
  }
  func.func @transform_4(%arg0: i32, %arg1: i32) -> (i32, i32) {
    %c0_i32 = arith.constant 0 : i32
    %c0_i32_0 = arith.constant 0 : i32
    %c0_i32_1 = arith.constant 0 : i32
    return %c0_i32, %c0_i32_0 : i32, i32
  }
  func.func @transform_5(%arg0: i32, %arg1: i32) -> (i32, i32) {
    %c0_i32 = arith.constant 0 : i32
    %c0_i32_0 = arith.constant 0 : i32
    return %arg0, %c0_i32 : i32, i32
  }
}

module attributes {stable_mosaic.version = 11 : i64} {
  func.func @mlp_kernel(%arg0: i32, %arg1: i32, %arg2: memref<256x128xf32, #tpu.memory_space<vmem>>, %arg3: memref<128x128xf32, #tpu.memory_space<vmem>>, %arg4: memref<1x128xf32, #tpu.memory_space<vmem>>, %arg5: memref<128x128xf32, #tpu.memory_space<vmem>>, %arg6: memref<1x128xf32, #tpu.memory_space<vmem>>, %arg7: memref<256x128xf32, #tpu.memory_space<vmem>>, %arg8: memref<256x128xf32, #tpu.memory_space<vmem>>) attributes {dimension_semantics = [#tpu.dimension_semantics<parallel>, #tpu.dimension_semantics<arbitrary>], iteration_bounds = array<i64: 2, 1>, scalar_prefetch = 0 : i64, scratch_operands = 1 : i64, tpu.core_type = #tpu.core_type<tc>, window_params = [{transform_indices = @transform_0, window_bounds = array<i64: 256, 128>}, {transform_indices = @transform_1, window_bounds = array<i64: 128, 128>}, {transform_indices = @transform_2, window_bounds = array<i64: 1, 128>}, {transform_indices = @transform_3, window_bounds = array<i64: 128, 128>}, {pipeline_mode = #tpu.pipeline_mode<synchronous>, transform_indices = @transform_4, window_bounds = array<i64: 1, 128>}, {transform_indices = @transform_5, window_bounds = array<i64: 256, 128>}]} {
    %c0_i32 = arith.constant 0 : i32
    %0 = arith.cmpi eq, %arg1, %c0_i32 : i32
    %1 = arith.extui %0 : i1 to i32
    %c0_i32_0 = arith.constant 0 : i32
    %2 = arith.cmpi ne, %1, %c0_i32_0 : i32
    scf.if %2 {
      %cst_18 = arith.constant 0.000000e+00 : f32
      %25 = vector.broadcast %cst_18 : f32 to vector<256x128xf32>
      %c0_19 = arith.constant 0 : index
      %c0_20 = arith.constant 0 : index
      %26 = vector.load %arg8[%c0_19, %c0_20] : memref<256x128xf32, #tpu.memory_space<vmem>>, vector<256x128xf32>
      tpu.vector_store %arg8[%c0_19, %c0_20], %25 {strides = array<i32>} : memref<256x128xf32, #tpu.memory_space<vmem>>, vector<256x128xf32>,
    } else {
    }
    %c0 = arith.constant 0 : index
    %c0_1 = arith.constant 0 : index
    %3 = vector.load %arg2[%c0, %c0_1] : memref<256x128xf32, #tpu.memory_space<vmem>>, vector<256x128xf32>
    %c0_2 = arith.constant 0 : index
    %c0_3 = arith.constant 0 : index
    %4 = vector.load %arg3[%c0_2, %c0_3] : memref<128x128xf32, #tpu.memory_space<vmem>>, vector<128x128xf32>
    %cst = arith.constant dense<0.000000e+00> : vector<256x128xf32>
    %5 = tpu.matmul %3, %4, %cst {dimension_numbers = #tpu.dot_dimension_numbers<[1], [0], [0], [1], [0, 0, 1, 1], [], []>} : vector<256x128xf32>, vector<128x128xf32>, vector<256x128xf32> -> vector<256x128xf32>
    %c0_4 = arith.constant 0 : index
    %c0_5 = arith.constant 0 : index
    %6 = vector.load %arg4[%c0_4, %c0_5] : memref<1x128xf32, #tpu.memory_space<vmem>>, vector<1x128xf32>
    %7 = vector.broadcast %6 : vector<1x128xf32> to vector<256x128xf32>
    %8 = arith.addf %5, %7 : vector<256x128xf32>
    %cst_6 = arith.constant 5.000000e-01 : f32
    %9 = vector.broadcast %cst_6 : f32 to vector<256x128xf32>
    %10 = arith.mulf %9, %8 : vector<256x128xf32>
    %cst_7 = arith.constant 0.707106769 : f32
    %11 = vector.broadcast %cst_7 : f32 to vector<256x128xf32>
    %12 = arith.mulf %8, %11 : vector<256x128xf32>
    %13 = math.erf %12 : vector<256x128xf32>
    %cst_8 = arith.constant 1.000000e+00 : f32
    %14 = vector.broadcast %cst_8 : f32 to vector<256x128xf32>
    %15 = arith.addf %14, %13 : vector<256x128xf32>
    %16 = arith.mulf %10, %15 : vector<256x128xf32>
    %c0_9 = arith.constant 0 : index
    %c0_10 = arith.constant 0 : index
    %17 = vector.load %arg5[%c0_9, %c0_10] : memref<128x128xf32, #tpu.memory_space<vmem>>, vector<128x128xf32>
    %c0_11 = arith.constant 0 : index
    %c0_12 = arith.constant 0 : index
    %18 = vector.load %arg8[%c0_11, %c0_12] : memref<256x128xf32, #tpu.memory_space<vmem>>, vector<256x128xf32>
    %cst_13 = arith.constant dense<0.000000e+00> : vector<256x128xf32>
    %19 = tpu.matmul %16, %17, %cst_13 {dimension_numbers = #tpu.dot_dimension_numbers<[1], [0], [0], [1], [0, 0, 1, 1], [], []>} : vector<256x128xf32>, vector<128x128xf32>, vector<256x128xf32> -> vector<256x128xf32>
    %20 = arith.addf %18, %19 : vector<256x128xf32>
    %c0_14 = arith.constant 0 : index
    %c0_15 = arith.constant 0 : index
    %21 = vector.load %arg8[%c0_14, %c0_15] : memref<256x128xf32, #tpu.memory_space<vmem>>, vector<256x128xf32>
    tpu.vector_store %arg8[%c0_14, %c0_15], %20 {strides = array<i32>} : memref<256x128xf32, #tpu.memory_space<vmem>>, vector<256x128xf32>,
    %c0_i32_16 = arith.constant 0 : i32
    %22 = arith.cmpi eq, %arg1, %c0_i32_16 : i32
    %23 = arith.extui %22 : i1 to i32
    %c0_i32_17 = arith.constant 0 : i32
    %24 = arith.cmpi ne, %23, %c0_i32_17 : i32
    scf.if %24 {
      %c0_18 = arith.constant 0 : index
      %c0_19 = arith.constant 0 : index
      %25 = vector.load %arg8[%c0_18, %c0_19] : memref<256x128xf32, #tpu.memory_space<vmem>>, vector<256x128xf32>
      %c0_20 = arith.constant 0 : index
      %c0_21 = arith.constant 0 : index
      %26 = vector.load %arg6[%c0_20, %c0_21] : memref<1x128xf32, #tpu.memory_space<vmem>>, vector<1x128xf32>
      %27 = vector.broadcast %26 : vector<1x128xf32> to vector<256x128xf32>
      %28 = arith.addf %25, %27 : vector<256x128xf32>
      %c0_22 = arith.constant 0 : index
      %c0_23 = arith.constant 0 : index
      %29 = vector.load %arg7[%c0_22, %c0_23] : memref<256x128xf32, #tpu.memory_space<vmem>>, vector<256x128xf32>
      tpu.vector_store %arg7[%c0_22, %c0_23], %28 {strides = array<i32>} : memref<256x128xf32, #tpu.memory_space<vmem>>, vector<256x128xf32>,
    } else {
    }
    return
  }
  func.func @transform_0(%arg0: i32, %arg1: i32) -> (i32, i32) {
    %c0_i32 = arith.constant 0 : i32
    %c0_i32_0 = arith.constant 0 : i32
    return %arg0, %c0_i32 : i32, i32
  }
  func.func @transform_1(%arg0: i32, %arg1: i32) -> (i32, i32) {
    %c0_i32 = arith.constant 0 : i32
    %c0_i32_0 = arith.constant 0 : i32
    return %c0_i32, %arg1 : i32, i32
  }
  func.func @transform_2(%arg0: i32, %arg1: i32) -> (i32, i32) {
    %c0_i32 = arith.constant 0 : i32
    %c0_i32_0 = arith.constant 0 : i32
    return %c0_i32, %arg1 : i32, i32
  }
  func.func @transform_3(%arg0: i32, %arg1: i32) -> (i32, i32) {
    %c0_i32 = arith.constant 0 : i32
    %c0_i32_0 = arith.constant 0 : i32
    return %arg1, %c0_i32 : i32, i32
  }
  func.func @transform_4(%arg0: i32, %arg1: i32) -> (i32, i32) {
    %c0_i32 = arith.constant 0 : i32
    %c0_i32_0 = arith.constant 0 : i32
    %c0_i32_1 = arith.constant 0 : i32
    return %c0_i32, %c0_i32_0 : i32, i32
  }
  func.func @transform_5(%arg0: i32, %arg1: i32) -> (i32, i32) {
    %c0_i32 = arith.constant 0 : i32
    %c0_i32_0 = arith.constant 0 : i32
    return %arg0, %c0_i32 : i32, i32
  }
}

</mosaic_0001>

<bundles_post_ra>
// kernel: tpu_custom_call.1
= control target key start
LH: loop header
LB: loop body
LE: loop exit
PB: predicated region body
PF: predicated region fallthrough
CT: control target
= control target key end

     0   :  { %10 = vsyncpa [#allocation4], 0  ;;  %s2563_s0 = inlined_call_operand.hbm [shape: f32[512,128], index: 0, kind: input, shape index: {}]   ;;  %s2564_s1 = inlined_call_operand.hbm [shape: f32[128,128], index: 1, kind: input, shape index: {}]   ;;  %s2565_s2 = inlined_call_operand.vmem [shape: f32[1,128], index: 2, kind: input, shape index: {}]   ;;  %s2566_s3 = inlined_call_operand.hbm [shape: f32[128,128], index: 3, kind: input, shape index: {}]   ;;  %s2567_s4 = inlined_call_operand.vmem [shape: f32[1,128], index: 4, kind: input, shape index: {}]   ;;  %s2568_s5 = inlined_call_operand.hbm [shape: f32[512,128], index: 5, kind: output, shape index: {}]  }
   0x1   :  { %12 = vsyncpa [#allocation4 + $0x1], 0 }
   0x2   :  { %13 = vsyncpa [#allocation7], 0 }
   0x3   :  { %14 = vsyncpa [#allocation5], 0 }
   0x4   :  { %16 = vsyncpa [#allocation5 + $0x1], 0  ;;  %s2072_s18 = smov 0   ;;  %s2074_s19 = smov 0  }
   0x5   :  { %s2076_s20 = smov 0   ;;  %s2078_s21 = smov 0  }
   0x6   :  { %s2080_s22 = smov 0   ;;  %s2082_s23 = smov 0  }
   0x7 LB: > { %s1365_s24 = sadd.s32 4294967295, %s2032_s23   ;;  %s1366_s25 = sadd.s32 4294967294, %s2032_s23   ;;  %s2032_s23 = sphi %s2082_s23, %s22_s23   ;;  %s2028_s22 = sphi %s2080_s22, %s2592_s22   ;;  %s2024_s21 = sphi %s2078_s21, %s2591_s21   ;;  %s2020_s20 = sphi %s2076_s20, %s2590_s20   ;;  %s2016_s19 = sphi %s2074_s19, %s2589_s19   ;;  %s2012_s18 = sphi %s2072_s18, %s2588_s18  }
   0x8   : > { %p54_p0 = scmp.ne.s32.totalorder %s2016_s19, %s2012_s18  ;;  %p2106_p1 = scmp.eq.s32.totalorder %s1365_s24, 0 }
   0x9   : > { %p2110_p2 = scmp.eq.s32.totalorder %s1365_s24, 1  ;;  %p183_p3 = scmp.eq.s32.totalorder %s1366_s25, 1 }
   0xa   : > { %s2574_s26 = scalar_select %p2106_p1, 1, 0 }
   0xb   : > { %p2116_p4 = por %p2106_p1, %p54_p0  ;;  %p1367_p5 = scmp.ge.s32.totalorder %s2032_s23, 1 }
   0xc   : > { %p2121_p6 = por %p183_p3, %p54_p0  ;;  %p190_p7 = scmp.lt.s32.totalorder %s2032_s23, 3 }
   0xd   : > { %s2576_s28 = scalar_select %p2116_p4, 1, 0 }
   0xe   : > { %s2577_s29 = scalar_select %p2121_p6, 1, 0 }
   0xf   : > { %p2126_p8 = pnand %p1367_p5, %p190_p7  ;;  %s2034_s6 = smov [#allocation6]  }
  0x10   : > { %s204_s7 = sshll.u32 %s2034_s6, 4  ;;  %s2035_s9 = smov [#allocation8]   ;;  %s2130_s7 = int_to_ptr.vmem [resolvable:$true] %s204_s7 }
  0x11   : > { %p1721_p9 = pneg %p2126_p8  ;;  %s226_s10 = sshll.u32 %s2035_s9, 4  ;;  %s2141_s10 = int_to_ptr.vmem [resolvable:$true] %s226_s10 }
  0x12   : > { %s1860_s13 = scalar_lea.hbm %s2564_s1, 2048 }
  0x13   : > { %p2137_p11 = pnand %p1721_p9, %p2106_p1  ;;  %p1861_p12 = scmp.ne.s32.totalorder %s2564_s1, %s1860_s13 }
  0x14   : > { %p1867_p5 = scmp.lt.u32.totalorder %s1860_s13, %s2564_s1 }
  0x15   : > { %p1862_p13 = pneg %p2137_p11 }
  0x17   : > { %p1863_p0 = pnand %p1862_p13, %p1861_p12 }
  0x19   : > { %p1864_p3 = pneg %p1863_p0 }
  0x1b   : > { %p1869_p7 = pnand %p1867_p5, %p1864_p3 }
  0x1d   : > { %1872 = shalt.err (!%p1869_p7)
}
  0x1e   : > { %s1873_s24 = scalar_lea.vmem %s2130_s7, 2048  ;;  %p1881_p1 = scmp.lt.s32.totalorder %s2130_s7, %s2130_s7 }
  0x1f   : > { %p1874_p9 = scmp.ne.s32.totalorder %s2130_s7, %s1873_s24  ;;  %p1882_p12 = scmp.lt.s32.totalorder %s1873_s24, %s1873_s24 }
  0x21   : > { %p1876_p10 = pnand %p1874_p9, %p1862_p13  ;;  %p1883_p0 = por %p1882_p12, %p1881_p1 }
  0x23   : > { %p1877_p6 = pneg %p1876_p10 }
  0x25   : > { %p1884_p4 = pnand %p1883_p0, %p1877_p6 }
  0x27   : > { %1887 = shalt.err (!%p1884_p4)
}
  0x28   : > { %s2572_s25 = smov 128   ;;  %s2037_s6 = smov 8  }
  0x29   : > { %1724 = dma.hbm_to_vmem [thread:$0]  (!%p2137_p11), %s2564_s1, 2048, %s2130_s7, [#allocation7], %s2572_s25, %s2572_s25, %s2037_s6  }
  0x2a   : > { %s1888_s14 = scalar_lea.hbm %s2566_s3, 2048 }
  0x2b   : > { %p1889_p1 = scmp.ne.s32.totalorder %s2566_s3, %s1888_s14  ;;  %p1895_p10 = scmp.lt.u32.totalorder %s1888_s14, %s2566_s3 }
  0x2d   : > { %p1891_p4 = pnand %p1889_p1, %p1862_p13 }
  0x2f   : > { %p1892_p6 = pneg %p1891_p4 }
  0x31   : > { %p1897_p3 = pnand %p1895_p10, %p1892_p6 }
  0x33   : > { %1900 = shalt.err (!%p1897_p3)
}
  0x34   : > { %s1901_s7 = scalar_lea.vmem %s2141_s10, 2048  ;;  %p1909_p12 = scmp.lt.s32.totalorder %s2141_s10, %s2141_s10 }
  0x35   : > { %p1902_p5 = scmp.ne.s32.totalorder %s2141_s10, %s1901_s7  ;;  %p1910_p0 = scmp.lt.s32.totalorder %s1901_s7, %s1901_s7 }
  0x37   : > { %p1904_p7 = pnand %p1902_p5, %p1862_p13  ;;  %p1911_p1 = por %p1910_p0, %p1909_p12 }
  0x39   : > { %p1905_p9 = pneg %p1904_p7 }
  0x3b   : > { %p1912_p4 = pnand %p1911_p1, %p1905_p9 }
  0x3d   : > { %1915 = shalt.err (!%p1912_p4)
}
  0x3e   : > { %1727 = dma.hbm_to_vmem [thread:$0]  (!%p2137_p11), %s2566_s3, 2048, %s2141_s10, [#allocation7], %s2572_s25, %s2572_s25, %s2037_s6  }
  0x3f   : > { %s34_s8 = sadd.s32 1, %s2028_s22  ;;  %s41_s12 = sadd.s32 1, %s2020_s20 }
  0x40   : > { %p36_p13 = scmp.ge.s32.totalorder %s34_s8, 2  ;;  %p48_p6 = scmp.ne.s32.totalorder %s2020_s20, %s2016_s19 }
  0x41   : > { %p49_p10 = scmp.eq.s32.totalorder %s2032_s23, 0  ;;  %p1738_p3 = scmp.lt.s32.totalorder %s2032_s23, 2 }
  0x42   : > { %s2594_s8 = smov (%p36_p13, %s34_s8), 0  ;;  %p2211_p7 = por %p2110_p2, %p48_p6 }
  0x43   : > { %p50_p5 = por %p49_p10, %p48_p6  ;;  %s38_s14 = ssub.s32 %s2028_s22, %s2594_s8 }
  0x44   : > { %s2580_s13 = scalar_select %p2211_p7, 1, 0 }
  0x45   : > { %s243_s15 = sand.u32 1, %s2020_s20   ;;  %p39_p9 = scmp.eq.s32.totalorder %s38_s14, 0 }
  0x46   : > { %s1372_s10 = sshll.u32 %s243_s15, 8  ;;  %s1387_s16 = sshll.u32 %s2028_s22, 12 }
  0x47   : > { %s2220_s17 = scalar_select %p39_p9, %s2020_s20, %s41_s12  }
  0x48   : > { %s2225_s9 = scalar_lea.hbm %s2563_s0, %s1387_s16  ;;  %s247_s27 = scalar_lea.vmem [#allocation3], %s1372_s10 }
  0x49   : > { %s254_s11 = sshll.u32 %s247_s27, 4  ;;  %p2229_p2 = pnand %p1738_p3, %p50_p5  ;;  %s2233_s11 = int_to_ptr.vmem [resolvable:$true] %s254_s11 }
  0x4a   : > { %s2235_s12 = scalar_lea.sflag [#allocation4], %s243_s15  ;;  %s1916_s14 = scalar_lea.hbm %s2225_s9, 4096 }
  0x4b   : > { %p1917_p11 = scmp.ne.s32.totalorder %s2225_s9, %s1916_s14  ;;  %p1918_p12 = pneg %p2229_p2 }
  0x4c   : > { %s1921_s24 = scalar_lea.hbm %s2563_s0, 8192  ;;  %p1922_p4 = scmp.lt.u32.totalorder %s2225_s9, %s2563_s0 }
  0x4d   : > { %p1919_p0 = pnand %p1918_p12, %p1917_p11  ;;  %p1923_p13 = scmp.lt.u32.totalorder %s1921_s24, %s1916_s14 }
  0x4e   : > { %p1925_p10 = scmp.lt.u32.totalorder %s1916_s14, %s2225_s9 }
  0x4f   : > { %p1920_p1 = pneg %p1919_p0  ;;  %p1924_p6 = por %p1923_p13, %p1922_p4 }
  0x51   : > { %p1926_p3 = por %p1925_p10, %p1924_p6 }
  0x53   : > { %p1927_p5 = pnand %p1926_p3, %p1920_p1 }
  0x55   : > { %1930 = shalt.err (!%p1927_p5)
}
  0x56   : > { %s1931_s15 = scalar_lea.vmem %s2233_s11, 4096  ;;  %s2038_s10 = smov [#allocation3]  }
  0x57   : > { %p1932_p9 = scmp.ne.s32.totalorder %s2233_s11, %s1931_s15  ;;  %s1936_s16 = sshll.u32 %s2038_s10, 4  ;;  %s1937_s16 = int_to_ptr.vmem [resolvable:$false] %s1936_s16 }
  0x58   : > { %s1938_s7 = scalar_lea.vmem %s1937_s16, 8192  ;;  %p1939_p7 = scmp.lt.s32.totalorder %s2233_s11, %s1937_s16 }
  0x59   : > { %p1934_p11 = pnand %p1932_p9, %p1918_p12  ;;  %p1940_p4 = scmp.lt.s32.totalorder %s1938_s7, %s1931_s15 }
  0x5b   : > { %p1935_p0 = pneg %p1934_p11  ;;  %p1941_p13 = por %p1940_p4, %p1939_p7 }
  0x5d   : > { %p1942_p6 = pnand %p1941_p13, %p1935_p0 }
  0x5f   : > { %1945 = shalt.err (!%p1942_p6)
}
  0x60   : > { %s2582_s14 = smov 128   ;;  %266 = sbr.rel (%p2126_p8) target bundleno = 665 (0x299), region = 40 }
  0x61   : > { %1731 = dma.hbm_to_vmem [thread:$0]  (!%p2229_p2), %s2225_s9, 4096, %s2233_s11, %s2235_s12, %s2582_s14, %s2582_s14, %s2037_s6  }
  0x62   : > { %s2269_s24 = sand.u32 (!%p2126_p8), 1, %s2016_s19   ;;  %p2583_p7 = scmp.ne.s32.totalorder (!%p2126_p8), %s2576_s28, 0 }
  0x63   : > { %s1376_s27 = sshll.u32 (!%p2126_p8), %s2269_s24, 8  ;;  %s269_s15 = scalar_lea.sflag (!%p2126_p8), [#allocation4], %s2269_s24 }
  0x64   : > { %s2275_s25 = scalar_lea.vmem (!%p2126_p8), [#allocation3], %s1376_s27 }
  0x67   : > { %1999 = dma.done.wait (%p2583_p7), %s269_s15, 4096  }
  0x68   : > { %2001 = vsyncadd (%p2583_p7), %s269_s15, 4294963200  ;;  %p2584_p2 = scmp.ne.s32.totalorder %s2574_s26, 0 }
  0x6a   : > { %2003 = dma.done.wait (%p2584_p2), [#allocation7], 4096  }
  0x6b   : > { %2005 = vsyncadd (%p2584_p2), [#allocation7], 4294963200  ;;  %v384_v0 = vld [vmem:[#allocation6] sm:$0xff]  ;;  %v385_v1 = vld [vmem:[#allocation6 + $0x8] sm:$0xff]  ;;  %s2443_s9 = scalar_lea.vmem [#allocation9], %s1376_s27  ;;  %s1388_s11 = sshll.u32 %s2024_s21, 12 }
  0x6c   : > { %v386_v2 = vld [vmem:[#allocation6 + $0x10] sm:$0xff]  ;;  %v1645_v3 = vpack.c.bf16 %v385_v1, %v384_v0  ;;  %v387_v4 = vld [vmem:[#allocation6 + $0x18] sm:$0xff]  ;;  %v388_v6 = vld [vmem:[#allocation6 + $0x20] sm:$0xff]  ;;  %s1249_s12 = sshll.u32 %s2443_s9, 4  ;;  %s2509_s7 = scalar_lea.hbm %s2568_s5, %s1388_s11  ;;  %s2511_s12 = int_to_ptr.vmem [resolvable:$true] %s1249_s12 }
  0x6d   : > { %v1649_v5 = vpack.c.bf16 %v387_v4, %v386_v2  ;;  %v389_v7 = vld [vmem:[#allocation6 + $0x28] sm:$0xff]  ;;  %v352_v9 = vld [vmem:[%s2275_s25] sm:$0xff]  ;;  %v390_v10 = vld [vmem:[#allocation6 + $0x30] sm:$0xff]  ;;  %s1236_s21 = scalar_lea.sflag [#allocation5], %s2269_s24  ;;  %s1946_s14 = scalar_lea.vmem %s2511_s12, 4096 }
  0x6e   : > { %1646 = vmatprep.subr.bf16.mxu0 %v1645_v3  ;;  %v1653_v8 = vpack.c.bf16 %v389_v7, %v388_v6  ;;  %v391_v11 = vld [vmem:[#allocation6 + $0x38] sm:$0xff]  ;;  %1517 = vmatprep.mubr.f32.mxu0 %v352_v9  ;;  %v392_v13 = vld [vmem:[#allocation6 + $0x40] sm:$0xff]  ;;  %v393_v14 = vld [vmem:[#allocation6 + $0x48] sm:$0xff]  ;;  %p1947_p8 = scmp.ne.s32.totalorder %s2511_s12, %s1946_s14  ;;  %p2585_p12 = scmp.ne.s32.totalorder %s2580_s13, 0 }
  0x6f   : > { %1648 = vmatpush3.bf16.msra.mxu0 %v1645_v3  ;;  %v1657_v12 = vpack.c.bf16 %v391_v11, %v390_v10  ;;  %v1661_v15 = vpack.c.bf16 %v393_v14, %v392_v13  ;;  %v394_v16 = vld [vmem:[#allocation6 + $0x50] sm:$0xff]  ;;  %v395_v17 = vld [vmem:[#allocation6 + $0x58] sm:$0xff]  ;;  %v792_v18 = vld [vmem:[#allocation8] sm:$0xff]  ;;  %s2039_s27 = smov [#allocation9]  }
  0x70   : > { %1650 = vmatprep.subr.bf16.mxu0 %v1649_v5  ;;  %v793_v19 = vld [vmem:[#allocation8 + $0x8] sm:$0xff]  ;;  %v794_v20 = vld [vmem:[#allocation8 + $0x10] sm:$0xff]  ;;  %v1665_v21 = vpack.c.bf16 %v395_v17, %v394_v16  ;;  %v396_v22 = vld [vmem:[#allocation6 + $0x60] sm:$0xff]  ;;  %p1948_p1 = pnand %p1947_p8, %p2585_p12  ;;  %s1950_s15 = sshll.u32 %s2039_s27, 4  ;;  %s1951_s15 = int_to_ptr.vmem [resolvable:$false] %s1950_s15 }
  0x71   : > { %v1677_v23 = vpack.c.bf16 %v793_v19, %v792_v18  ;;  %v795_v24 = vld [vmem:[#allocation8 + $0x18] sm:$0xff]  ;;  %v397_v25 = vld [vmem:[#allocation6 + $0x68] sm:$0xff]  ;;  %v796_v27 = vld [vmem:[#allocation8 + $0x20] sm:$0xff]  ;;  %p1953_p3 = scmp.lt.s32.totalorder %s2511_s12, %s1951_s15 }
  0x72   : > { %v1681_v26 = vpack.c.bf16 %v795_v24, %v794_v20  ;;  %v797_v28 = vld [vmem:[#allocation8 + $0x28] sm:$0xff]  ;;  %v1669_v29 = vpack.c.bf16 %v397_v25, %v396_v22  ;;  %v398_v31 = vld [vmem:[#allocation6 + $0x70] sm:$0xff]  ;;  %v399_v32 = vld [vmem:[#allocation6 + $0x78] sm:$0xff]  ;;  %p1949_p10 = pneg %p1948_p1 }
  0x73   : > { %1652 = vmatpush3.bf16.msra.mxu0 %v1649_v5  ;;  %1678 = vmatprep.subr.bf16.mxu1 %v1677_v23  ;;  %v1685_v30 = vpack.c.bf16 %v797_v28, %v796_v27  ;;  %v1673_v33 = vpack.c.bf16 %v399_v32, %v398_v31  ;;  %v353_v34 = vld [vmem:[%s2275_s25 + $0x8] sm:$0xff]  ;;  %v354_v35 = vld [vmem:[%s2275_s25 + $0x10] sm:$0xff]  ;;  %v355_v36 = vld [vmem:[%s2275_s25 + $0x18] sm:$0xff] }
  0x74   : > { %1654 = vmatprep.subr.bf16.mxu0 %v1653_v8  ;;  %1680 = vmatpush3.bf16.msra.mxu1 %v1677_v23  ;;  %v356_v37 = vld [vmem:[%s2275_s25 + $0x20] sm:$0xff]  ;;  %v357_v38 = vld [vmem:[%s2275_s25 + $0x28] sm:$0xff]  ;;  %v358_v39 = vld [vmem:[%s2275_s25 + $0x30] sm:$0xff] }
  0x75   : > { %1682 = vmatprep.subr.bf16.mxu1 %v1681_v26  ;;  %v359_v40 = vld [vmem:[%s2275_s25 + $0x38] sm:$0xff]  ;;  %v360_v41 = vld [vmem:[%s2275_s25 + $0x40] sm:$0xff]  ;;  %v361_v42 = vld [vmem:[%s2275_s25 + $0x48] sm:$0xff] }
  0x76   : > { %v362_v43 = vld [vmem:[%s2275_s25 + $0x50] sm:$0xff]  ;;  %v363_v44 = vld [vmem:[%s2275_s25 + $0x58] sm:$0xff]  ;;  %v364_v45 = vld [vmem:[%s2275_s25 + $0x60] sm:$0xff] }
  0x77   : > { %1656 = vmatpush3.bf16.msra.mxu0 %v1653_v8  ;;  %v365_v46 = vld [vmem:[%s2275_s25 + $0x68] sm:$0xff]  ;;  %v366_v47 = vld [vmem:[%s2275_s25 + $0x70] sm:$0xff]  ;;  %v367_v48 = vld [vmem:[%s2275_s25 + $0x78] sm:$0xff] }
  0x78   : > { %1658 = vmatprep.subr.bf16.mxu0 %v1657_v12  ;;  %1684 = vmatpush3.bf16.msra.mxu1 %v1681_v26  ;;  %v368_v49 = vld [vmem:[%s2275_s25 + $0x80] sm:$0xff]  ;;  %v369_v50 = vld [vmem:[%s2275_s25 + $0x88] sm:$0xff]  ;;  %v370_v51 = vld [vmem:[%s2275_s25 + $0x90] sm:$0xff] }
  0x79   : > { %1686 = vmatprep.subr.bf16.mxu1 %v1685_v30  ;;  %v371_v52 = vld [vmem:[%s2275_s25 + $0x98] sm:$0xff]  ;;  %v372_v53 = vld [vmem:[%s2275_s25 + $0xa0] sm:$0xff]  ;;  %v373_v54 = vld [vmem:[%s2275_s25 + $0xa8] sm:$0xff] }
  0x7a   : > { %v374_v55 = vld [vmem:[%s2275_s25 + $0xb0] sm:$0xff]  ;;  %v375_v56 = vld [vmem:[%s2275_s25 + $0xb8] sm:$0xff]  ;;  %v376_v57 = vld [vmem:[%s2275_s25 + $0xc0] sm:$0xff] }
  0x7b   : > { %1660 = vmatpush3.bf16.msra.mxu0 %v1657_v12  ;;  %v377_v58 = vld [vmem:[%s2275_s25 + $0xc8] sm:$0xff]  ;;  %v378_v59 = vld [vmem:[%s2275_s25 + $0xd0] sm:$0xff]  ;;  %v379_v60 = vld [vmem:[%s2275_s25 + $0xd8] sm:$0xff] }
  0x7c   : > { %1662 = vmatprep.subr.bf16.mxu0 %v1661_v15  ;;  %1688 = vmatpush3.bf16.msra.mxu1 %v1685_v30  ;;  %v380_v61 = vld [vmem:[%s2275_s25 + $0xe0] sm:$0xff]  ;;  %v381_v62 = vld [vmem:[%s2275_s25 + $0xe8] sm:$0xff]  ;;  %v382_v63 = vld [vmem:[%s2275_s25 + $0xf0] sm:$0xff] }
  0x7d   : > { %v383_v0 = vld [vmem:[%s2275_s25 + $0xf8] sm:$0xff]  ;;  %v798_v1 = vld [vmem:[#allocation8 + $0x30] sm:$0xff]  ;;  %v800_v4 = vld [vmem:[#allocation8 + $0x40] sm:$0xff]  ;;  %s1952_s25 = scalar_lea.vmem %s1951_s15, 8192 }
  0x7e   : > { %v799_v2 = vld [vmem:[#allocation8 + $0x38] sm:$0xff]  ;;  %v801_v5 = vld [vmem:[#allocation8 + $0x48] sm:$0xff]  ;;  %v802_v7 = vld [vmem:[#allocation8 + $0x50] sm:$0xff]  ;;  %p1954_p5 = scmp.lt.s32.totalorder %s1952_s25, %s1946_s14 }
  0x7f   : > { %1664 = vmatpush3.bf16.msra.mxu0 %v1661_v15  ;;  %v1689_v3 = vpack.c.bf16 %v799_v2, %v798_v1  ;;  %v1693_v6 = vpack.c.bf16 %v801_v5, %v800_v4  ;;  %v803_v8 = vld [vmem:[#allocation8 + $0x58] sm:$0xff]  ;;  %v804_v10 = vld [vmem:[#allocation8 + $0x60] sm:$0xff]  ;;  %v805_v11 = vld [vmem:[#allocation8 + $0x68] sm:$0xff] }
  0x80   : > { %1666 = vmatprep.subr.bf16.mxu0 %v1665_v21  ;;  %v1697_v9 = vpack.c.bf16 %v803_v8, %v802_v7  ;;  %v1701_v12 = vpack.c.bf16 %v805_v11, %v804_v10  ;;  %v806_v13 = vld [vmem:[#allocation8 + $0x70] sm:$0xff]  ;;  %v807_v14 = vld [vmem:[#allocation8 + $0x78] sm:$0xff]  ;;  %v2320_v16 = vld [vmem:[%s2565_s2] ss:$0 sm:$0xff]  ;;  %p1955_p9 = por %p1954_p5, %p1953_p3 }
  0x81   : > { %1690 = vmatprep.subr.bf16.mxu1 %v1689_v3  ;;  %v1705_v15 = vpack.c.bf16 %v807_v14, %v806_v13 }
  0x82   : > { %1692 = vmatpush3.bf16.msra.mxu1 %v1689_v3  ;;  %p1956_p11 = pnand %p1955_p9, %p1949_p10 }
  0x83   : > { %1668 = vmatpush3.bf16.msra.mxu0 %v1665_v21  ;;  %1694 = vmatprep.subr.bf16.mxu1 %v1693_v6 }
  0x84   : > { %1670 = vmatprep.subr.bf16.mxu0 %v1669_v29 }
  0x86   : > { %1696 = vmatpush3.bf16.msra.mxu1 %v1693_v6 }
  0x87   : > { %1672 = vmatpush3.bf16.msra.mxu0 %v1669_v29  ;;  %1698 = vmatprep.subr.bf16.mxu1 %v1697_v9 }
  0x88   : > { %1674 = vmatprep.subr.bf16.mxu0 %v1673_v33 }
  0x8a   : > { %1700 = vmatpush3.bf16.msra.mxu1 %v1697_v9 }
  0x8b   : > { %1676 = vmatpush3.bf16.msra.mxu0 %v1673_v33  ;;  %1702 = vmatprep.subr.bf16.mxu1 %v1701_v12 }
  0x8e   : > { %1518 = vmatmul.mubr.f32.vlgmr.msra.gmra.mrb[0].mxu0 %v353_v34  ;;  %1704 = vmatpush3.bf16.msra.mxu1 %v1701_v12 }
  0x8f   : > { %1520 = vmatprep.mubr.f32.mxu0 %v354_v35  ;;  %1706 = vmatprep.subr.bf16.mxu1 %v1705_v15 }
  0x92   : > { %1521 = vmatmul.mubr.f32.gmra.mrb[2].mxu0 %v355_v36  ;;  %1708 = vmatpush3.bf16.msra.mxu1 %v1705_v15 }
  0x93   : > { %1523 = vmatprep.mubr.f32.mxu0 %v356_v37 }
  0x96   : > { %1524 = vmatmul.mubr.f32.gmra.mrb[4].mxu0 %v357_v38 }
  0x97   : > { %1526 = vmatprep.mubr.f32.mxu0 %v358_v39 }
  0x9a   : > { %1527 = vmatmul.mubr.f32.gmra.mrb[6].mxu0 %v359_v40 }
  0x9b   : > { %1529 = vmatprep.mubr.f32.mxu0 %v360_v41 }
  0x9e   : > { %1530 = vmatmul.mubr.f32.gmra.mrb[8].mxu0 %v361_v42 }
  0x9f   : > { %1532 = vmatprep.mubr.f32.mxu0 %v362_v43 }
  0xa2   : > { %1533 = vmatmul.mubr.f32.gmra.mrb[10].mxu0 %v363_v44 }
  0xa3   : > { %1535 = vmatprep.mubr.f32.mxu0 %v364_v45 }
  0xa6   : > { %1536 = vmatmul.mubr.f32.gmra.mrb[12].mxu0 %v365_v46 }
  0xa7   : > { %1538 = vmatprep.mubr.f32.mxu0 %v366_v47 }
  0xaa   : > { %1539 = vmatmul.mubr.f32.gmra.mrb[14].mxu0 %v367_v48 }
  0xab   : > { %1541 = vmatprep.mubr.f32.mxu0 %v368_v49 }
  0xae   : > { %1542 = vmatmul.mubr.f32.gmra.mrb[16].mxu0 %v369_v50 }
  0xaf   : > { %1544 = vmatprep.mubr.f32.mxu0 %v370_v51 }
  0xb2   : > { %1545 = vmatmul.mubr.f32.gmra.mrb[18].mxu0 %v371_v52 }
  0xb3   : > { %1547 = vmatprep.mubr.f32.mxu0 %v372_v53 }
  0xb6   : > { %1548 = vmatmul.mubr.f32.gmra.mrb[20].mxu0 %v373_v54 }
  0xb7   : > { %1550 = vmatprep.mubr.f32.mxu0 %v374_v55 }
  0xba   : > { %1551 = vmatmul.mubr.f32.gmra.mrb[22].mxu0 %v375_v56 }
  0xbb   : > { %1553 = vmatprep.mubr.f32.mxu0 %v376_v57 }
  0xbe   : > { %1554 = vmatmul.mubr.f32.gmra.mrb[24].mxu0 %v377_v58 }
  0xbf   : > { %1556 = vmatprep.mubr.f32.mxu0 %v378_v59 }
  0xc2   : > { %1557 = vmatmul.mubr.f32.gmra.mrb[26].mxu0 %v379_v60 }
  0xc3   : > { %1559 = vmatprep.mubr.f32.mxu0 %v380_v61 }
  0xc6   : > { %1560 = vmatmul.mubr.f32.gmra.mrb[28].mxu0 %v381_v62 }
  0xc7   : > { %1562 = vmatprep.mubr.f32.mxu0 %v382_v63 }
  0xca   : > { %1563 = vmatmul.mubr.f32.gmra.mrb[30].mxu0 %v383_v0 }
 0x161   : > { %v1519_v17 = vpop.f32.mrb[0].mxu0 }
 0x162   : > { %v479_v18 = vadd.f32 %v1519_v17, %v2320_v16  ;;  %v473_v19 = vpop.f32.mrb[1].mxu0 }
 0x163   : > { %v474_v20 = vadd.f32 %v2320_v16, %v473_v19 }
 0x164   : > { %v665_v21 = vmul.f32 0.70710677, %v479_v18  ;;  %v633_v49 = vmul.f32 0.5, %v479_v18 }
 0x165   : > { %v664_v22 = vmul.f32 0.70710677, %v474_v20  ;;  %v1522_v23 = vpop.f32.mrb[2].mxu0  ;;  %v632_v47 = vmul.f32 0.5, %v474_v20 }
 0x166   : > { %1796 = verf.f32 %v665_v21  ;;  %v489_v24 = vadd.f32 %v1522_v23, %v2320_v16  ;;  %v483_v25 = vpop.f32.mrb[3].mxu0 }
 0x167   : > { %1798 = verf.f32 %v664_v22  ;;  %v484_v26 = vadd.f32 %v2320_v16, %v483_v25 }
 0x168   : > { %v667_v27 = vmul.f32 0.70710677, %v489_v24  ;;  %v635_v63 = vmul.f32 0.5, %v489_v24 }
 0x169   : > { %v666_v28 = vmul.f32 0.70710677, %v484_v26  ;;  %v1525_v29 = vpop.f32.mrb[4].mxu0  ;;  %v634_v59 = vmul.f32 0.5, %v484_v26 }
 0x16a   : > { %1800 = verf.f32 %v667_v27  ;;  %v499_v30 = vadd.f32 %v1525_v29, %v2320_v16  ;;  %v493_v31 = vpop.f32.mrb[5].mxu0 }
 0x16b   : > { %1802 = verf.f32 %v666_v28  ;;  %v494_v32 = vadd.f32 %v2320_v16, %v493_v31 }
 0x16c   : > { %v669_v33 = vmul.f32 0.70710677, %v499_v30  ;;  %v637_v13 = vmul.f32 0.5, %v499_v30 }
 0x16d   : > { %v668_v34 = vmul.f32 0.70710677, %v494_v32  ;;  %v1528_v35 = vpop.f32.mrb[6].mxu0  ;;  %v636_v9 = vmul.f32 0.5, %v494_v32 }
 0x16e   : > { %1804 = verf.f32 %v669_v33  ;;  %v2329_v36 = vadd.f32 %v1528_v35, %v2320_v16  ;;  %v503_v37 = vpop.f32.mrb[7].mxu0 }
 0x16f   : > { %1806 = verf.f32 %v668_v34  ;;  %v504_v38 = vadd.f32 %v2320_v16, %v503_v37 }
 0x170   : > { %v1797_v39 = vpop.eup %1796  ;;  %v671_v40 = vmul.f32 0.70710677, %v2329_v36  ;;  %v639_v28 = vmul.f32 0.5, %v2329_v36 }
 0x171   : > { %v1799_v41 = vpop.eup %1798  ;;  %v729_v42 = vadd.f32 1.0, %v1797_v39  ;;  %v670_v43 = vmul.f32 0.70710677, %v504_v38  ;;  %v1531_v44 = vpop.f32.mrb[8].mxu0  ;;  %v638_v24 = vmul.f32 0.5, %v504_v38 }
 0x172   : > { %1808 = verf.f32 %v671_v40  ;;  %v2334_v45 = vadd.f32 %v1531_v44, %v2320_v16  ;;  %v513_v46 = vpop.f32.mrb[9].mxu0  ;;  %v728_v48 = vadd.f32 1.0, %v1799_v41 }
 0x173   : > { %1810 = verf.f32 %v670_v43  ;;  %v2337_v50 = vadd.f32 %v2320_v16, %v513_v46  ;;  %v761_v58 = vmul.f32 %v729_v42, %v633_v49 }
 0x174   : > { %v1801_v51 = vpop.eup %1800  ;;  %v673_v52 = vmul.f32 0.70710677, %v2334_v45  ;;  %v760_v53 = vmul.f32 %v728_v48, %v632_v47  ;;  %v641_v42 = vmul.f32 0.5, %v2334_v45 }
 0x175   : > { %v1803_v54 = vpop.eup %1802  ;;  %v731_v55 = vadd.f32 1.0, %v1801_v51  ;;  %v672_v56 = vmul.f32 0.70710677, %v2337_v50  ;;  %v1534_v57 = vpop.f32.mrb[10].mxu0  ;;  %v640_v39 = vmul.f32 0.5, %v2337_v50 }
 0x176   : > { %v730_v60 = vadd.f32 1.0, %v1803_v54  ;;  %1812 = verf.f32 %v673_v52  ;;  %v2342_v61 = vadd.f32 %v1534_v57, %v2320_v16  ;;  %v523_v62 = vpop.f32.mrb[11].mxu0  ;;  %1597 = vmatprep.mubr.f32.mxu1 %v760_v53 }
 0x177   : > { %1814 = verf.f32 %v672_v56  ;;  %v2345_v0 = vadd.f32 %v2320_v16, %v523_v62  ;;  %1598 = vmatmul.mubr.f32.vlgmr.msra.gmra.mrb[0].mxu1 %v761_v58  ;;  %v763_v8 = vmul.f32 %v731_v55, %v635_v63 }
 0x178   : > { %v1805_v1 = vpop.eup %1804  ;;  %v675_v2 = vmul.f32 0.70710677, %v2342_v61  ;;  %v762_v3 = vmul.f32 %v730_v60, %v634_v59  ;;  %v643_v56 = vmul.f32 0.5, %v2342_v61 }
 0x179   : > { %v1807_v4 = vpop.eup %1806  ;;  %v733_v5 = vadd.f32 1.0, %v1805_v1  ;;  %v674_v6 = vmul.f32 0.70710677, %v2345_v0  ;;  %v1537_v7 = vpop.f32.mrb[12].mxu0  ;;  %v642_v53 = vmul.f32 0.5, %v2345_v0 }
 0x17a   : > { %v732_v10 = vadd.f32 1.0, %v1807_v4  ;;  %1816 = verf.f32 %v675_v2  ;;  %v2350_v11 = vadd.f32 %v1537_v7, %v2320_v16  ;;  %v533_v12 = vpop.f32.mrb[13].mxu0  ;;  %1600 = vmatprep.mubr.f32.mxu1 %v762_v3 }
 0x17b   : > { %1818 = verf.f32 %v674_v6  ;;  %v2353_v14 = vadd.f32 %v2320_v16, %v533_v12  ;;  %1601 = vmatmul.mubr.f32.gmra.mrb[2].mxu1 %v763_v8  ;;  %v765_v23 = vmul.f32 %v733_v5, %v637_v13 }
 0x17c   : > { %v1809_v15 = vpop.eup %1808  ;;  %v677_v17 = vmul.f32 0.70710677, %v2350_v11  ;;  %v764_v18 = vmul.f32 %v732_v10, %v636_v9  ;;  %v645_v6 = vmul.f32 0.5, %v2350_v11 }
 0x17d   : > { %v1811_v19 = vpop.eup %1810  ;;  %v735_v20 = vadd.f32 1.0, %v1809_v15  ;;  %v676_v21 = vmul.f32 0.70710677, %v2353_v14  ;;  %v1540_v22 = vpop.f32.mrb[14].mxu0  ;;  %v644_v3 = vmul.f32 0.5, %v2353_v14 }
 0x17e   : > { %v734_v25 = vadd.f32 1.0, %v1811_v19  ;;  %1820 = verf.f32 %v677_v17  ;;  %v2358_v26 = vadd.f32 %v1540_v22, %v2320_v16  ;;  %v543_v27 = vpop.f32.mrb[15].mxu0  ;;  %1603 = vmatprep.mubr.f32.mxu1 %v764_v18 }
 0x17f   : > { %1822 = verf.f32 %v676_v21  ;;  %v2362_v29 = vadd.f32 %v2320_v16, %v543_v27  ;;  %1604 = vmatmul.mubr.f32.gmra.mrb[4].mxu1 %v765_v23  ;;  %v767_v38 = vmul.f32 %v735_v20, %v639_v28 }
 0x180   : > { %v1813_v30 = vpop.eup %1812  ;;  %v679_v31 = vmul.f32 0.70710677, %v2358_v26  ;;  %v766_v32 = vmul.f32 %v734_v25, %v638_v24  ;;  %v647_v21 = vmul.f32 0.5, %v2358_v26 }
 0x181   : > { %v1815_v33 = vpop.eup %1814  ;;  %v737_v34 = vadd.f32 1.0, %v1813_v30  ;;  %v678_v35 = vmul.f32 0.70710677, %v2362_v29  ;;  %v1543_v37 = vpop.f32.mrb[16].mxu0  ;;  %v646_v18 = vmul.f32 0.5, %v2362_v29 }
 0x182   : > { %v736_v40 = vadd.f32 1.0, %v1815_v33  ;;  %1824 = verf.f32 %v679_v31  ;;  %v2368_v36 = vadd.f32 %v1543_v37, %v2320_v16  ;;  %v553_v41 = vpop.f32.mrb[17].mxu0  ;;  %1606 = vmatprep.mubr.f32.mxu1 %v766_v32 }
 0x183   : > { %1826 = verf.f32 %v678_v35  ;;  %v2372_v43 = vadd.f32 %v2320_v16, %v553_v41  ;;  %1607 = vmatmul.mubr.f32.gmra.mrb[6].mxu1 %v767_v38  ;;  %v769_v52 = vmul.f32 %v737_v34, %v641_v42 }
 0x184   : > { %v1817_v44 = vpop.eup %1816  ;;  %v681_v46 = vmul.f32 0.70710677, %v2368_v36  ;;  %v768_v47 = vmul.f32 %v736_v40, %v640_v39  ;;  %v649_v35 = vmul.f32 0.5, %v2368_v36 }
 0x185   : > { %v1819_v48 = vpop.eup %1818  ;;  %v739_v49 = vadd.f32 1.0, %v1817_v44  ;;  %v680_v50 = vmul.f32 0.70710677, %v2372_v43  ;;  %v1546_v51 = vpop.f32.mrb[18].mxu0  ;;  %v648_v32 = vmul.f32 0.5, %v2372_v43 }
 0x186   : > { %v738_v54 = vadd.f32 1.0, %v1819_v48  ;;  %1828 = verf.f32 %v681_v46  ;;  %v2378_v45 = vadd.f32 %v1546_v51, %v2320_v16  ;;  %v563_v55 = vpop.f32.mrb[19].mxu0  ;;  %1609 = vmatprep.mubr.f32.mxu1 %v768_v47 }
 0x187   : > { %1830 = verf.f32 %v680_v50  ;;  %v2382_v57 = vadd.f32 %v2320_v16, %v563_v55  ;;  %1610 = vmatmul.mubr.f32.gmra.mrb[8].mxu1 %v769_v52  ;;  %v771_v2 = vmul.f32 %v739_v49, %v643_v56 }
 0x188   : > { %v1821_v58 = vpop.eup %1820  ;;  %v683_v59 = vmul.f32 0.70710677, %v2378_v45  ;;  %v770_v60 = vmul.f32 %v738_v54, %v642_v53  ;;  %v651_v50 = vmul.f32 0.5, %v2378_v45 }
 0x189   : > { %v1823_v62 = vpop.eup %1822  ;;  %v741_v63 = vadd.f32 1.0, %v1821_v58  ;;  %v682_v0 = vmul.f32 0.70710677, %v2382_v57  ;;  %v1549_v1 = vpop.f32.mrb[20].mxu0  ;;  %v650_v47 = vmul.f32 0.5, %v2382_v57 }
 0x18a   : > { %v740_v4 = vadd.f32 1.0, %v1823_v62  ;;  %1832 = verf.f32 %v683_v59  ;;  %v2388_v61 = vadd.f32 %v1549_v1, %v2320_v16  ;;  %v573_v5 = vpop.f32.mrb[21].mxu0  ;;  %1612 = vmatprep.mubr.f32.mxu1 %v770_v60 }
 0x18b   : > { %1834 = verf.f32 %v682_v0  ;;  %v2392_v7 = vadd.f32 %v2320_v16, %v573_v5  ;;  %1613 = vmatmul.mubr.f32.gmra.mrb[10].mxu1 %v771_v2  ;;  %v773_v17 = vmul.f32 %v741_v63, %v645_v6 }
 0x18c   : > { %v1825_v8 = vpop.eup %1824  ;;  %v685_v9 = vmul.f32 0.70710677, %v2388_v61  ;;  %v772_v10 = vmul.f32 %v740_v4, %v644_v3  ;;  %v653_v0 = vmul.f32 0.5, %v2388_v61 }
 0x18d   : > { %v1827_v12 = vpop.eup %1826  ;;  %v743_v13 = vadd.f32 1.0, %v1825_v8  ;;  %v684_v14 = vmul.f32 0.70710677, %v2392_v7  ;;  %v1552_v15 = vpop.f32.mrb[22].mxu0  ;;  %v652_v60 = vmul.f32 0.5, %v2392_v7 }
 0x18e   : > { %v742_v19 = vadd.f32 1.0, %v1827_v12  ;;  %1836 = verf.f32 %v685_v9  ;;  %v2398_v11 = vadd.f32 %v1552_v15, %v2320_v16  ;;  %v583_v20 = vpop.f32.mrb[23].mxu0  ;;  %1615 = vmatprep.mubr.f32.mxu1 %v772_v10 }
 0x18f   : > { %1838 = verf.f32 %v684_v14  ;;  %v2402_v22 = vadd.f32 %v2320_v16, %v583_v20  ;;  %1616 = vmatmul.mubr.f32.gmra.mrb[12].mxu1 %v773_v17  ;;  %v775_v31 = vmul.f32 %v743_v13, %v647_v21 }
 0x190   : > { %v1829_v23 = vpop.eup %1828  ;;  %v687_v24 = vmul.f32 0.70710677, %v2398_v11  ;;  %v774_v25 = vmul.f32 %v742_v19, %v646_v18  ;;  %v655_v61 = vmul.f32 0.5, %v2398_v11 }
 0x191   : > { %v1831_v27 = vpop.eup %1830  ;;  %v745_v28 = vadd.f32 1.0, %v1829_v23  ;;  %v686_v29 = vmul.f32 0.70710677, %v2402_v22  ;;  %v1555_v30 = vpop.f32.mrb[24].mxu0  ;;  %v654_v10 = vmul.f32 0.5, %v2402_v22 }
 0x192   : > { %v744_v33 = vadd.f32 1.0, %v1831_v27  ;;  %1840 = verf.f32 %v687_v24  ;;  %v2408_v26 = vadd.f32 %v1555_v30, %v2320_v16  ;;  %v593_v34 = vpop.f32.mrb[25].mxu0  ;;  %1618 = vmatprep.mubr.f32.mxu1 %v774_v25 }
 0x193   : > { %1842 = verf.f32 %v686_v29  ;;  %v2412_v37 = vadd.f32 %v2320_v16, %v593_v34  ;;  %1619 = vmatmul.mubr.f32.gmra.mrb[14].mxu1 %v775_v31  ;;  %v777_v46 = vmul.f32 %v745_v28, %v649_v35 }
 0x194   : > { %v1833_v38 = vpop.eup %1832  ;;  %v689_v39 = vmul.f32 0.70710677, %v2408_v26  ;;  %v776_v40 = vmul.f32 %v744_v33, %v648_v32  ;;  %v657_v27 = vmul.f32 0.5, %v2408_v26 }
 0x195   : > { %v1835_v41 = vpop.eup %1834  ;;  %v747_v42 = vadd.f32 1.0, %v1833_v38  ;;  %v688_v43 = vmul.f32 0.70710677, %v2412_v37  ;;  %v1558_v44 = vpop.f32.mrb[26].mxu0  ;;  %v656_v22 = vmul.f32 0.5, %v2412_v37 }
 0x196   : > { %v746_v48 = vadd.f32 1.0, %v1835_v41  ;;  %1844 = verf.f32 %v689_v39  ;;  %v2418_v36 = vadd.f32 %v1558_v44, %v2320_v16  ;;  %v603_v49 = vpop.f32.mrb[27].mxu0  ;;  %1621 = vmatprep.mubr.f32.mxu1 %v776_v40 }
 0x197   : > { %1846 = verf.f32 %v688_v43  ;;  %v604_v51 = vadd.f32 %v2320_v16, %v603_v49  ;;  %1622 = vmatmul.mubr.f32.gmra.mrb[16].mxu1 %v777_v46  ;;  %v779_v59 = vmul.f32 %v747_v42, %v651_v50 }
 0x198   : > { %v1837_v52 = vpop.eup %1836  ;;  %v691_v53 = vmul.f32 0.70710677, %v2418_v36  ;;  %v778_v54 = vmul.f32 %v746_v48, %v650_v47  ;;  %v659_v33 = vmul.f32 0.5, %v2418_v36 }
 0x199   : > { %v1839_v55 = vpop.eup %1838  ;;  %v749_v56 = vadd.f32 1.0, %v1837_v52  ;;  %v690_v57 = vmul.f32 0.70710677, %v604_v51  ;;  %v1561_v58 = vpop.f32.mrb[28].mxu0  ;;  %v658_v31 = vmul.f32 0.5, %v604_v51 }
 0x19a   : > { %v748_v62 = vadd.f32 1.0, %v1839_v55  ;;  %1848 = verf.f32 %v691_v53  ;;  %v619_v63 = vadd.f32 %v1561_v58, %v2320_v16  ;;  %v613_v45 = vpop.f32.mrb[29].mxu0  ;;  %1624 = vmatprep.mubr.f32.mxu1 %v778_v54  ;;  %v2437_v52 = vld [vmem:[%s2567_s4] ss:$0 sm:$0xff] }
 0x19b   : > { %1850 = verf.f32 %v690_v57  ;;  %v614_v1 = vadd.f32 %v2320_v16, %v613_v45  ;;  %1625 = vmatmul.mubr.f32.gmra.mrb[18].mxu1 %v779_v59  ;;  %v781_v7 = vmul.f32 %v749_v56, %v653_v0 }
 0x19c   : > { %v1841_v2 = vpop.eup %1840  ;;  %v693_v3 = vmul.f32 0.70710677, %v619_v63  ;;  %v780_v4 = vmul.f32 %v748_v62, %v652_v60  ;;  %v661_v41 = vmul.f32 0.5, %v619_v63 }
 0x19d   : > { %v1843_v5 = vpop.eup %1842  ;;  %v751_v6 = vadd.f32 1.0, %v1841_v2  ;;  %v692_v8 = vmul.f32 0.70710677, %v614_v1  ;;  %v1564_v9 = vpop.f32.mrb[30].mxu0  ;;  %v660_v40 = vmul.f32 0.5, %v614_v1 }
 0x19e   : > { %v750_v12 = vadd.f32 1.0, %v1843_v5  ;;  %1852 = verf.f32 %v693_v3  ;;  %v629_v13 = vadd.f32 %v1564_v9, %v2320_v16  ;;  %v623_v14 = vpop.f32.mrb[31].mxu0  ;;  %1627 = vmatprep.mubr.f32.mxu1 %v780_v4 }
 0x19f   : > { %1854 = verf.f32 %v692_v8  ;;  %v624_v15 = vadd.f32 %v2320_v16, %v623_v14  ;;  %1628 = vmatmul.mubr.f32.gmra.mrb[20].mxu1 %v781_v7  ;;  %v783_v24 = vmul.f32 %v751_v6, %v655_v61 }
 0x1a0   : > { %v1845_v17 = vpop.eup %1844  ;;  %v695_v18 = vmul.f32 0.70710677, %v629_v13  ;;  %v782_v19 = vmul.f32 %v750_v12, %v654_v10  ;;  %v663_v36 = vmul.f32 0.5, %v629_v13 }
 0x1a1   : > { %v1847_v20 = vpop.eup %1846  ;;  %v753_v21 = vadd.f32 1.0, %v1845_v17  ;;  %v694_v23 = vmul.f32 0.70710677, %v624_v15  ;;  %v662_v48 = vmul.f32 0.5, %v624_v15 }
 0x1a2   : > { %v752_v25 = vadd.f32 1.0, %v1847_v20  ;;  %1856 = verf.f32 %v695_v18  ;;  %1630 = vmatprep.mubr.f32.mxu1 %v782_v19 }
 0x1a3   : > { %1858 = verf.f32 %v694_v23  ;;  %1631 = vmatmul.mubr.f32.gmra.mrb[22].mxu1 %v783_v24  ;;  %v785_v30 = vmul.f32 %v753_v21, %v657_v27 }
 0x1a4   : > { %v1849_v11 = vpop.eup %1848  ;;  %v784_v28 = vmul.f32 %v752_v25, %v656_v22 }
 0x1a5   : > { %v1851_v16 = vpop.eup %1850  ;;  %v755_v29 = vadd.f32 1.0, %v1849_v11 }
 0x1a6   : > { %v754_v32 = vadd.f32 1.0, %v1851_v16  ;;  %1633 = vmatprep.mubr.f32.mxu1 %v784_v28 }
 0x1a7   : > { %1634 = vmatmul.mubr.f32.gmra.mrb[24].mxu1 %v785_v30  ;;  %v787_v39 = vmul.f32 %v755_v29, %v659_v33 }
 0x1a8   : > { %v1853_v34 = vpop.eup %1852  ;;  %v786_v35 = vmul.f32 %v754_v32, %v658_v31 }
 0x1a9   : > { %v1855_v37 = vpop.eup %1854  ;;  %v757_v38 = vadd.f32 1.0, %v1853_v34 }
 0x1aa   : > { %v756_v26 = vadd.f32 1.0, %v1855_v37  ;;  %1636 = vmatprep.mubr.f32.mxu1 %v786_v35 }
 0x1ab   : > { %1637 = vmatmul.mubr.f32.gmra.mrb[26].mxu1 %v787_v39  ;;  %v789_v47 = vmul.f32 %v757_v38, %v661_v41 }
 0x1ac   : > { %v1857_v42 = vpop.eup %1856  ;;  %v788_v43 = vmul.f32 %v756_v26, %v660_v40 }
 0x1ad   : > { %v1859_v44 = vpop.eup %1858  ;;  %v759_v46 = vadd.f32 1.0, %v1857_v42 }
 0x1ae   : > { %v758_v49 = vadd.f32 1.0, %v1859_v44  ;;  %1639 = vmatprep.mubr.f32.mxu1 %v788_v43 }
 0x1af   : > { %1640 = vmatmul.mubr.f32.gmra.mrb[28].mxu1 %v789_v47  ;;  %v791_v51 = vmul.f32 %v759_v46, %v663_v36 }
 0x1b0   : > { %v790_v50 = vmul.f32 %v758_v49, %v662_v48 }
 0x1b2   : > { %1642 = vmatprep.mubr.f32.mxu1 %v790_v50 }
 0x1b3   : > { %1643 = vmatmul.mubr.f32.gmra.mrb[30].mxu1 %v791_v51 }
 0x24a   : > { %v1599_v53 = vpop.f32.mrb[0].mxu1 }
 0x24b   : > { %v1172_v54 = vadd.f32 %v1599_v53, %v2437_v52  ;;  %v906_v55 = vpop.f32.mrb[1].mxu1 }
 0x24c   : > { %v1171_v56 = vadd.f32 %v2437_v52, %v906_v55 }
 0x24d   : > { %1204 = vst [vmem:[%s2443_s9 + $0x8] sm:$0xff] %v1172_v54 }
 0x24e   : > { %1203 = vst [vmem:[%s2443_s9] sm:$0xff] %v1171_v56  ;;  %v1602_v57 = vpop.f32.mrb[2].mxu1 }
 0x24f   : > { %v1174_v58 = vadd.f32 %v1602_v57, %v2437_v52  ;;  %v916_v59 = vpop.f32.mrb[3].mxu1 }
 0x250   : > { %v1173_v60 = vadd.f32 %v2437_v52, %v916_v59 }
 0x251   : > { %1206 = vst [vmem:[%s2443_s9 + $0x18] sm:$0xff] %v1174_v58 }
 0x252   : > { %1205 = vst [vmem:[%s2443_s9 + $0x10] sm:$0xff] %v1173_v60  ;;  %v1605_v62 = vpop.f32.mrb[4].mxu1 }
 0x253   : > { %v1176_v63 = vadd.f32 %v1605_v62, %v2437_v52  ;;  %v926_v45 = vpop.f32.mrb[5].mxu1 }
 0x254   : > { %v1175_v0 = vadd.f32 %v2437_v52, %v926_v45 }
 0x255   : > { %1208 = vst [vmem:[%s2443_s9 + $0x28] sm:$0xff] %v1176_v63 }
 0x256   : > { %1207 = vst [vmem:[%s2443_s9 + $0x20] sm:$0xff] %v1175_v0  ;;  %v1608_v1 = vpop.f32.mrb[6].mxu1 }
 0x257   : > { %v1178_v2 = vadd.f32 %v1608_v1, %v2437_v52  ;;  %v936_v3 = vpop.f32.mrb[7].mxu1 }
 0x258   : > { %v1177_v4 = vadd.f32 %v2437_v52, %v936_v3 }
 0x259   : > { %1210 = vst [vmem:[%s2443_s9 + $0x38] sm:$0xff] %v1178_v2 }
 0x25a   : > { %1209 = vst [vmem:[%s2443_s9 + $0x30] sm:$0xff] %v1177_v4  ;;  %v1611_v5 = vpop.f32.mrb[8].mxu1 }
 0x25b   : > { %v1180_v6 = vadd.f32 %v1611_v5, %v2437_v52  ;;  %v946_v8 = vpop.f32.mrb[9].mxu1 }
 0x25c   : > { %v1179_v9 = vadd.f32 %v2437_v52, %v946_v8 }
 0x25d   : > { %1212 = vst [vmem:[%s2443_s9 + $0x48] sm:$0xff] %v1180_v6 }
 0x25e   : > { %1211 = vst [vmem:[%s2443_s9 + $0x40] sm:$0xff] %v1179_v9  ;;  %v1614_v7 = vpop.f32.mrb[10].mxu1 }
 0x25f   : > { %v1182_v10 = vadd.f32 %v1614_v7, %v2437_v52  ;;  %v956_v12 = vpop.f32.mrb[11].mxu1 }
 0x260   : > { %v1181_v13 = vadd.f32 %v2437_v52, %v956_v12 }
 0x261   : > { %1214 = vst [vmem:[%s2443_s9 + $0x58] sm:$0xff] %v1182_v10 }
 0x262   : > { %1213 = vst [vmem:[%s2443_s9 + $0x50] sm:$0xff] %v1181_v13  ;;  %v1617_v14 = vpop.f32.mrb[12].mxu1 }
 0x263   : > { %v1184_v61 = vadd.f32 %v1617_v14, %v2437_v52  ;;  %v966_v15 = vpop.f32.mrb[13].mxu1 }
 0x264   : > { %v1183_v17 = vadd.f32 %v2437_v52, %v966_v15 }
 0x265   : > { %1216 = vst [vmem:[%s2443_s9 + $0x68] sm:$0xff] %v1184_v61 }
 0x266   : > { %1215 = vst [vmem:[%s2443_s9 + $0x60] sm:$0xff] %v1183_v17  ;;  %v1620_v18 = vpop.f32.mrb[14].mxu1 }
 0x267   : > { %v1186_v19 = vadd.f32 %v1620_v18, %v2437_v52  ;;  %v976_v20 = vpop.f32.mrb[15].mxu1 }
 0x268   : > { %v1185_v21 = vadd.f32 %v2437_v52, %v976_v20 }
 0x269   : > { %1218 = vst [vmem:[%s2443_s9 + $0x78] sm:$0xff] %v1186_v19 }
 0x26a   : > { %1217 = vst [vmem:[%s2443_s9 + $0x70] sm:$0xff] %v1185_v21  ;;  %v1623_v23 = vpop.f32.mrb[16].mxu1 }
 0x26b   : > { %v1188_v24 = vadd.f32 %v1623_v23, %v2437_v52  ;;  %v986_v22 = vpop.f32.mrb[17].mxu1 }
 0x26c   : > { %v1187_v25 = vadd.f32 %v2437_v52, %v986_v22 }
 0x26d   : > { %1220 = vst [vmem:[%s2443_s9 + $0x88] sm:$0xff] %v1188_v24 }
 0x26e   : > { %1219 = vst [vmem:[%s2443_s9 + $0x80] sm:$0xff] %v1187_v25  ;;  %v1626_v27 = vpop.f32.mrb[18].mxu1 }
 0x26f   : > { %v1190_v11 = vadd.f32 %v1626_v27, %v2437_v52  ;;  %v996_v28 = vpop.f32.mrb[19].mxu1 }
 0x270   : > { %v1189_v16 = vadd.f32 %v2437_v52, %v996_v28 }
 0x271   : > { %1222 = vst [vmem:[%s2443_s9 + $0x98] sm:$0xff] %v1190_v11 }
 0x272   : > { %1221 = vst [vmem:[%s2443_s9 + $0x90] sm:$0xff] %v1189_v16  ;;  %v1629_v29 = vpop.f32.mrb[20].mxu1 }
 0x273   : > { %v1192_v30 = vadd.f32 %v1629_v29, %v2437_v52  ;;  %v1006_v31 = vpop.f32.mrb[21].mxu1 }
 0x274   : > { %v1191_v32 = vadd.f32 %v2437_v52, %v1006_v31 }
 0x275   : > { %1224 = vst [vmem:[%s2443_s9 + $0xa8] sm:$0xff] %v1192_v30 }
 0x276   : > { %1223 = vst [vmem:[%s2443_s9 + $0xa0] sm:$0xff] %v1191_v32  ;;  %v1632_v33 = vpop.f32.mrb[22].mxu1 }
 0x277   : > { %v1194_v34 = vadd.f32 %v1632_v33, %v2437_v52  ;;  %v1016_v35 = vpop.f32.mrb[23].mxu1 }
 0x278   : > { %v1193_v37 = vadd.f32 %v2437_v52, %v1016_v35 }
 0x279   : > { %1226 = vst [vmem:[%s2443_s9 + $0xb8] sm:$0xff] %v1194_v34 }
 0x27a   : > { %1225 = vst [vmem:[%s2443_s9 + $0xb0] sm:$0xff] %v1193_v37  ;;  %v1635_v38 = vpop.f32.mrb[24].mxu1 }
 0x27b   : > { %v1196_v39 = vadd.f32 %v1635_v38, %v2437_v52  ;;  %v1026_v40 = vpop.f32.mrb[25].mxu1 }
 0x27c   : > { %v1195_v26 = vadd.f32 %v2437_v52, %v1026_v40 }
 0x27d   : > { %1228 = vst [vmem:[%s2443_s9 + $0xc8] sm:$0xff] %v1196_v39 }
 0x27e   : > { %1227 = vst [vmem:[%s2443_s9 + $0xc0] sm:$0xff] %v1195_v26  ;;  %v1638_v41 = vpop.f32.mrb[26].mxu1 }
 0x27f   : > { %v1198_v42 = vadd.f32 %v1638_v41, %v2437_v52  ;;  %v1036_v43 = vpop.f32.mrb[27].mxu1 }
 0x280   : > { %v1197_v44 = vadd.f32 %v2437_v52, %v1036_v43 }
 0x281   : > { %1230 = vst [vmem:[%s2443_s9 + $0xd8] sm:$0xff] %v1198_v42 }
 0x282   : > { %1229 = vst [vmem:[%s2443_s9 + $0xd0] sm:$0xff] %v1197_v44  ;;  %v1641_v46 = vpop.f32.mrb[28].mxu1 }
 0x283   : > { %v1200_v47 = vadd.f32 %v1641_v46, %v2437_v52  ;;  %v1046_v48 = vpop.f32.mrb[29].mxu1 }
 0x284   : > { %v1199_v49 = vadd.f32 %v2437_v52, %v1046_v48 }
 0x285   : > { %1232 = vst [vmem:[%s2443_s9 + $0xe8] sm:$0xff] %v1200_v47 }
 0x286   : > { %1231 = vst [vmem:[%s2443_s9 + $0xe0] sm:$0xff] %v1199_v49  ;;  %v1644_v36 = vpop.f32.mrb[30].mxu1 }
 0x287   : > { %v1202_v50 = vadd.f32 %v1644_v36, %v2437_v52  ;;  %v1056_v51 = vpop.f32.mrb[31].mxu1 }
 0x288   : > { %v1201_v53 = vadd.f32 %v2437_v52, %v1056_v51 }
 0x289   : > { %1234 = vst [vmem:[%s2443_s9 + $0xf8] sm:$0xff] %v1202_v50 }
 0x28a   : > { %1233 = vst [vmem:[%s2443_s9 + $0xf0] sm:$0xff] %v1201_v53 }
 0x28b   : > { %1959 = shalt.err (!%p1956_p11)
}
 0x28c   : > { %s1960_s26 = scalar_lea.hbm %s2509_s7, 4096  ;;  %s1964_s6 = scalar_lea.hbm %s2568_s5, 8192 }
 0x28d   : > { %p1961_p0 = scmp.ne.s32.totalorder %s2509_s7, %s1960_s26  ;;  %p1965_p6 = scmp.lt.u32.totalorder %s2509_s7, %s2568_s5 }
 0x28e   : > { %p1966_p7 = scmp.lt.u32.totalorder %s1964_s6, %s1960_s26  ;;  %p1968_p8 = scmp.lt.u32.totalorder %s1960_s26, %s2509_s7 }
 0x28f   : > { %p1962_p4 = pnand %p1961_p0, %p2585_p12 }
 0x290   : > { %p1967_p2 = por %p1966_p7, %p1965_p6 }
 0x291   : > { %p1963_p13 = pneg %p1962_p4 }
 0x292   : > { %p1969_p1 = por %p1968_p8, %p1967_p2 }
 0x294   : > { %p1970_p10 = pnand %p1969_p1, %p1963_p13 }
 0x296   : > { %1973 = shalt.err (!%p1970_p10)
}
 0x297   : > { %s2040_s10 = smov 128   ;;  %s2041_s16 = smov 8  }
 0x298   : > { %1719 = dma.vmem_to_hbm [thread:$0]  (%p2585_p12), %s2511_s12, 4096, %s2509_s7, %s1236_s21, %s2040_s10, %s2040_s10, %s2041_s16  }
 0x299 PF: > { %s1264_s14 = sand.u32 1, %s2012_s18   ;;  %p2586_p3 = scmp.ne.s32.totalorder %s2577_s29, 0 }
 0x29a   : > { %p2587_p5 = scmp.ge.s32.totalorder %s2032_s23, 2  ;;  %s1265_s27 = scalar_lea.sflag [#allocation5], %s1264_s14 }
 0x29c   : > { %p1733_p9 = pnand %p2587_p5, %p2586_p3 }
 0x29e   : > { %2007 = dma.done.wait (!%p1733_p9), %s1265_s27, 4096  }
 0x29f   : > { %2009 = vsyncadd (!%p1733_p9), %s1265_s27, 4294963200  ;;  %s22_s23 = sadd.s32 1, %s2032_s23   ;;  %s2588_s18 = smov %s2016_s19 }
 0x2a0   : > { %p19_p11 = scmp.ge.s32.totalorder %s22_s23, 4   ;;  %s2589_s19 = smov %s2020_s20 }
 0x2a1   : > { %s2590_s20 = smov %s2220_s17  ;;  %s2591_s21 = smov %s2028_s22 }
 0x2a2   : > { %s2592_s22 = smov %s2594_s8  ;;  %21 = sbr.rel (!%p19_p11) target bundleno = 7 (0x7), region = 106 }
 0x2a9   :  { %1270 = vsyncpa [#allocation4], 1 }
 0x2aa   :  { %1272 = vsyncpa [#allocation4 + $0x1], 1 }
 0x2ab   :  { %1273 = vsyncpa [#allocation7], 1 }
 0x2ac   :  { %1274 = vsyncpa [#allocation5], 1 }
 0x2ad   :  { %1276 = vsyncpa [#allocation5 + $0x1], 1 }

// kernel: tpu_custom_call.1
= control target key start
LH: loop header
LB: loop body
LE: loop exit
PB: predicated region body
PF: predicated region fallthrough
CT: control target
= control target key end

     0   :  { %10 = vsyncpa [#allocation4], 0  ;;  %s2563_s0 = inlined_call_operand.hbm [shape: f32[512,128], index: 0, kind: input, shape index: {}]   ;;  %s2564_s1 = inlined_call_operand.hbm [shape: f32[128,128], index: 1, kind: input, shape index: {}]   ;;  %s2565_s2 = inlined_call_operand.vmem [shape: f32[1,128], index: 2, kind: input, shape index: {}]   ;;  %s2566_s3 = inlined_call_operand.hbm [shape: f32[128,128], index: 3, kind: input, shape index: {}]   ;;  %s2567_s4 = inlined_call_operand.vmem [shape: f32[1,128], index: 4, kind: input, shape index: {}]   ;;  %s2568_s5 = inlined_call_operand.hbm [shape: f32[512,128], index: 5, kind: output, shape index: {}]  }
   0x1   :  { %12 = vsyncpa [#allocation4 + $0x1], 0 }
   0x2   :  { %13 = vsyncpa [#allocation7], 0 }
   0x3   :  { %14 = vsyncpa [#allocation5], 0 }
   0x4   :  { %16 = vsyncpa [#allocation5 + $0x1], 0  ;;  %s2072_s18 = smov 0   ;;  %s2074_s19 = smov 0  }
   0x5   :  { %s2076_s20 = smov 0   ;;  %s2078_s21 = smov 0  }
   0x6   :  { %s2080_s22 = smov 0   ;;  %s2082_s23 = smov 0  }
   0x7 LB: > { %s1365_s24 = sadd.s32 4294967295, %s2032_s23   ;;  %s1366_s25 = sadd.s32 4294967294, %s2032_s23   ;;  %s2032_s23 = sphi %s2082_s23, %s22_s23   ;;  %s2028_s22 = sphi %s2080_s22, %s2592_s22   ;;  %s2024_s21 = sphi %s2078_s21, %s2591_s21   ;;  %s2020_s20 = sphi %s2076_s20, %s2590_s20   ;;  %s2016_s19 = sphi %s2074_s19, %s2589_s19   ;;  %s2012_s18 = sphi %s2072_s18, %s2588_s18  }
   0x8   : > { %p54_p0 = scmp.ne.s32.totalorder %s2016_s19, %s2012_s18  ;;  %p2106_p1 = scmp.eq.s32.totalorder %s1365_s24, 0 }
   0x9   : > { %p2110_p2 = scmp.eq.s32.totalorder %s1365_s24, 1  ;;  %p183_p3 = scmp.eq.s32.totalorder %s1366_s25, 1 }
   0xa   : > { %s2574_s26 = scalar_select %p2106_p1, 1, 0 }
   0xb   : > { %p2116_p4 = por %p2106_p1, %p54_p0  ;;  %p1367_p5 = scmp.ge.s32.totalorder %s2032_s23, 1 }
   0xc   : > { %p2121_p6 = por %p183_p3, %p54_p0  ;;  %p190_p7 = scmp.lt.s32.totalorder %s2032_s23, 3 }
   0xd   : > { %s2576_s28 = scalar_select %p2116_p4, 1, 0 }
   0xe   : > { %s2577_s29 = scalar_select %p2121_p6, 1, 0 }
   0xf   : > { %p2126_p8 = pnand %p1367_p5, %p190_p7  ;;  %s2034_s6 = smov [#allocation6]  }
  0x10   : > { %s204_s7 = sshll.u32 %s2034_s6, 4  ;;  %s2035_s9 = smov [#allocation8]   ;;  %s2130_s7 = int_to_ptr.vmem [resolvable:$true] %s204_s7 }
  0x11   : > { %p1721_p9 = pneg %p2126_p8  ;;  %s226_s10 = sshll.u32 %s2035_s9, 4  ;;  %s2141_s10 = int_to_ptr.vmem [resolvable:$true] %s226_s10 }
  0x12   : > { %s1860_s13 = scalar_lea.hbm %s2564_s1, 2048 }
  0x13   : > { %p2137_p11 = pnand %p1721_p9, %p2106_p1  ;;  %p1861_p12 = scmp.ne.s32.totalorder %s2564_s1, %s1860_s13 }
  0x14   : > { %p1867_p5 = scmp.lt.u32.totalorder %s1860_s13, %s2564_s1 }
  0x15   : > { %p1862_p13 = pneg %p2137_p11 }
  0x17   : > { %p1863_p0 = pnand %p1862_p13, %p1861_p12 }
  0x19   : > { %p1864_p3 = pneg %p1863_p0 }
  0x1b   : > { %p1869_p7 = pnand %p1867_p5, %p1864_p3 }
  0x1d   : > { %1872 = shalt.err (!%p1869_p7)
}
  0x1e   : > { %s1873_s24 = scalar_lea.vmem %s2130_s7, 2048  ;;  %p1881_p1 = scmp.lt.s32.totalorder %s2130_s7, %s2130_s7 }
  0x1f   : > { %p1874_p9 = scmp.ne.s32.totalorder %s2130_s7, %s1873_s24  ;;  %p1882_p12 = scmp.lt.s32.totalorder %s1873_s24, %s1873_s24 }
  0x21   : > { %p1876_p10 = pnand %p1874_p9, %p1862_p13  ;;  %p1883_p0 = por %p1882_p12, %p1881_p1 }
  0x23   : > { %p1877_p6 = pneg %p1876_p10 }
  0x25   : > { %p1884_p4 = pnand %p1883_p0, %p1877_p6 }
  0x27   : > { %1887 = shalt.err (!%p1884_p4)
}
  0x28   : > { %s2572_s25 = smov 128   ;;  %s2037_s6 = smov 8  }
  0x29   : > { %1724 = dma.hbm_to_vmem [thread:$0]  (!%p2137_p11), %s2564_s1, 2048, %s2130_s7, [#allocation7], %s2572_s25, %s2572_s25, %s2037_s6  }
  0x2a   : > { %s1888_s14 = scalar_lea.hbm %s2566_s3, 2048 }
  0x2b   : > { %p1889_p1 = scmp.ne.s32.totalorder %s2566_s3, %s1888_s14  ;;  %p1895_p10 = scmp.lt.u32.totalorder %s1888_s14, %s2566_s3 }
  0x2d   : > { %p1891_p4 = pnand %p1889_p1, %p1862_p13 }
  0x2f   : > { %p1892_p6 = pneg %p1891_p4 }
  0x31   : > { %p1897_p3 = pnand %p1895_p10, %p1892_p6 }
  0x33   : > { %1900 = shalt.err (!%p1897_p3)
}
  0x34   : > { %s1901_s7 = scalar_lea.vmem %s2141_s10, 2048  ;;  %p1909_p12 = scmp.lt.s32.totalorder %s2141_s10, %s2141_s10 }
  0x35   : > { %p1902_p5 = scmp.ne.s32.totalorder %s2141_s10, %s1901_s7  ;;  %p1910_p0 = scmp.lt.s32.totalorder %s1901_s7, %s1901_s7 }
  0x37   : > { %p1904_p7 = pnand %p1902_p5, %p1862_p13  ;;  %p1911_p1 = por %p1910_p0, %p1909_p12 }
  0x39   : > { %p1905_p9 = pneg %p1904_p7 }
  0x3b   : > { %p1912_p4 = pnand %p1911_p1, %p1905_p9 }
  0x3d   : > { %1915 = shalt.err (!%p1912_p4)
}
  0x3e   : > { %1727 = dma.hbm_to_vmem [thread:$0]  (!%p2137_p11), %s2566_s3, 2048, %s2141_s10, [#allocation7], %s2572_s25, %s2572_s25, %s2037_s6  }
  0x3f   : > { %s34_s8 = sadd.s32 1, %s2028_s22  ;;  %s41_s12 = sadd.s32 1, %s2020_s20 }
  0x40   : > { %p36_p13 = scmp.ge.s32.totalorder %s34_s8, 2  ;;  %p48_p6 = scmp.ne.s32.totalorder %s2020_s20, %s2016_s19 }
  0x41   : > { %p49_p10 = scmp.eq.s32.totalorder %s2032_s23, 0  ;;  %p1738_p3 = scmp.lt.s32.totalorder %s2032_s23, 2 }
  0x42   : > { %s2594_s8 = smov (%p36_p13, %s34_s8), 0  ;;  %p2211_p7 = por %p2110_p2, %p48_p6 }
  0x43   : > { %p50_p5 = por %p49_p10, %p48_p6  ;;  %s38_s14 = ssub.s32 %s2028_s22, %s2594_s8 }
  0x44   : > { %s2580_s13 = scalar_select %p2211_p7, 1, 0 }
  0x45   : > { %s243_s15 = sand.u32 1, %s2020_s20   ;;  %p39_p9 = scmp.eq.s32.totalorder %s38_s14, 0 }
  0x46   : > { %s1372_s10 = sshll.u32 %s243_s15, 8  ;;  %s1387_s16 = sshll.u32 %s2028_s22, 12 }
  0x47   : > { %s2220_s17 = scalar_select %p39_p9, %s2020_s20, %s41_s12  }
  0x48   : > { %s2225_s9 = scalar_lea.hbm %s2563_s0, %s1387_s16  ;;  %s247_s27 = scalar_lea.vmem [#allocation3], %s1372_s10 }
  0x49   : > { %s254_s11 = sshll.u32 %s247_s27, 4  ;;  %p2229_p2 = pnand %p1738_p3, %p50_p5  ;;  %s2233_s11 = int_to_ptr.vmem [resolvable:$true] %s254_s11 }
  0x4a   : > { %s2235_s12 = scalar_lea.sflag [#allocation4], %s243_s15  ;;  %s1916_s14 = scalar_lea.hbm %s2225_s9, 4096 }
  0x4b   : > { %p1917_p11 = scmp.ne.s32.totalorder %s2225_s9, %s1916_s14  ;;  %p1918_p12 = pneg %p2229_p2 }
  0x4c   : > { %s1921_s24 = scalar_lea.hbm %s2563_s0, 8192  ;;  %p1922_p4 = scmp.lt.u32.totalorder %s2225_s9, %s2563_s0 }
  0x4d   : > { %p1919_p0 = pnand %p1918_p12, %p1917_p11  ;;  %p1923_p13 = scmp.lt.u32.totalorder %s1921_s24, %s1916_s14 }
  0x4e   : > { %p1925_p10 = scmp.lt.u32.totalorder %s1916_s14, %s2225_s9 }
  0x4f   : > { %p1920_p1 = pneg %p1919_p0  ;;  %p1924_p6 = por %p1923_p13, %p1922_p4 }
  0x51   : > { %p1926_p3 = por %p1925_p10, %p1924_p6 }
  0x53   : > { %p1927_p5 = pnand %p1926_p3, %p1920_p1 }
  0x55   : > { %1930 = shalt.err (!%p1927_p5)
}
  0x56   : > { %s1931_s15 = scalar_lea.vmem %s2233_s11, 4096  ;;  %s2038_s10 = smov [#allocation3]  }
  0x57   : > { %p1932_p9 = scmp.ne.s32.totalorder %s2233_s11, %s1931_s15  ;;  %s1936_s16 = sshll.u32 %s2038_s10, 4  ;;  %s1937_s16 = int_to_ptr.vmem [resolvable:$false] %s1936_s16 }
  0x58   : > { %s1938_s7 = scalar_lea.vmem %s1937_s16, 8192  ;;  %p1939_p7 = scmp.lt.s32.totalorder %s2233_s11, %s1937_s16 }
  0x59   : > { %p1934_p11 = pnand %p1932_p9, %p1918_p12  ;;  %p1940_p4 = scmp.lt.s32.totalorder %s1938_s7, %s1931_s15 }
  0x5b   : > { %p1935_p0 = pneg %p1934_p11  ;;  %p1941_p13 = por %p1940_p4, %p1939_p7 }
  0x5d   : > { %p1942_p6 = pnand %p1941_p13, %p1935_p0 }
  0x5f   : > { %1945 = shalt.err (!%p1942_p6)
}
  0x60   : > { %s2582_s14 = smov 128   ;;  %266 = sbr.rel (%p2126_p8) target bundleno = 665 (0x299), region = 40 }
  0x61   : > { %1731 = dma.hbm_to_vmem [thread:$0]  (!%p2229_p2), %s2225_s9, 4096, %s2233_s11, %s2235_s12, %s2582_s14, %s2582_s14, %s2037_s6  }
  0x62   : > { %s2269_s24 = sand.u32 (!%p2126_p8), 1, %s2016_s19   ;;  %p2583_p7 = scmp.ne.s32.totalorder (!%p2126_p8), %s2576_s28, 0 }
  0x63   : > { %s1376_s27 = sshll.u32 (!%p2126_p8), %s2269_s24, 8  ;;  %s269_s15 = scalar_lea.sflag (!%p2126_p8), [#allocation4], %s2269_s24 }
  0x64   : > { %s2275_s25 = scalar_lea.vmem (!%p2126_p8), [#allocation3], %s1376_s27 }
  0x67   : > { %1999 = dma.done.wait (%p2583_p7), %s269_s15, 4096  }
  0x68   : > { %2001 = vsyncadd (%p2583_p7), %s269_s15, 4294963200  ;;  %p2584_p2 = scmp.ne.s32.totalorder %s2574_s26, 0 }
  0x6a   : > { %2003 = dma.done.wait (%p2584_p2), [#allocation7], 4096  }
  0x6b   : > { %2005 = vsyncadd (%p2584_p2), [#allocation7], 4294963200  ;;  %v384_v0 = vld [vmem:[#allocation6] sm:$0xff]  ;;  %v385_v1 = vld [vmem:[#allocation6 + $0x8] sm:$0xff]  ;;  %s2443_s9 = scalar_lea.vmem [#allocation9], %s1376_s27  ;;  %s1388_s11 = sshll.u32 %s2024_s21, 12 }
  0x6c   : > { %v386_v2 = vld [vmem:[#allocation6 + $0x10] sm:$0xff]  ;;  %v1645_v3 = vpack.c.bf16 %v385_v1, %v384_v0  ;;  %v387_v4 = vld [vmem:[#allocation6 + $0x18] sm:$0xff]  ;;  %v388_v6 = vld [vmem:[#allocation6 + $0x20] sm:$0xff]  ;;  %s1249_s12 = sshll.u32 %s2443_s9, 4  ;;  %s2509_s7 = scalar_lea.hbm %s2568_s5, %s1388_s11  ;;  %s2511_s12 = int_to_ptr.vmem [resolvable:$true] %s1249_s12 }
  0x6d   : > { %v1649_v5 = vpack.c.bf16 %v387_v4, %v386_v2  ;;  %v389_v7 = vld [vmem:[#allocation6 + $0x28] sm:$0xff]  ;;  %v352_v9 = vld [vmem:[%s2275_s25] sm:$0xff]  ;;  %v390_v10 = vld [vmem:[#allocation6 + $0x30] sm:$0xff]  ;;  %s1236_s21 = scalar_lea.sflag [#allocation5], %s2269_s24  ;;  %s1946_s14 = scalar_lea.vmem %s2511_s12, 4096 }
  0x6e   : > { %1646 = vmatprep.subr.bf16.mxu0 %v1645_v3  ;;  %v1653_v8 = vpack.c.bf16 %v389_v7, %v388_v6  ;;  %v391_v11 = vld [vmem:[#allocation6 + $0x38] sm:$0xff]  ;;  %1517 = vmatprep.mubr.f32.mxu0 %v352_v9  ;;  %v392_v13 = vld [vmem:[#allocation6 + $0x40] sm:$0xff]  ;;  %v393_v14 = vld [vmem:[#allocation6 + $0x48] sm:$0xff]  ;;  %p1947_p8 = scmp.ne.s32.totalorder %s2511_s12, %s1946_s14  ;;  %p2585_p12 = scmp.ne.s32.totalorder %s2580_s13, 0 }
  0x6f   : > { %1648 = vmatpush3.bf16.msra.mxu0 %v1645_v3  ;;  %v1657_v12 = vpack.c.bf16 %v391_v11, %v390_v10  ;;  %v1661_v15 = vpack.c.bf16 %v393_v14, %v392_v13  ;;  %v394_v16 = vld [vmem:[#allocation6 + $0x50] sm:$0xff]  ;;  %v395_v17 = vld [vmem:[#allocation6 + $0x58] sm:$0xff]  ;;  %v792_v18 = vld [vmem:[#allocation8] sm:$0xff]  ;;  %s2039_s27 = smov [#allocation9]  }
  0x70   : > { %1650 = vmatprep.subr.bf16.mxu0 %v1649_v5  ;;  %v793_v19 = vld [vmem:[#allocation8 + $0x8] sm:$0xff]  ;;  %v794_v20 = vld [vmem:[#allocation8 + $0x10] sm:$0xff]  ;;  %v1665_v21 = vpack.c.bf16 %v395_v17, %v394_v16  ;;  %v396_v22 = vld [vmem:[#allocation6 + $0x60] sm:$0xff]  ;;  %p1948_p1 = pnand %p1947_p8, %p2585_p12  ;;  %s1950_s15 = sshll.u32 %s2039_s27, 4  ;;  %s1951_s15 = int_to_ptr.vmem [resolvable:$false] %s1950_s15 }
  0x71   : > { %v1677_v23 = vpack.c.bf16 %v793_v19, %v792_v18  ;;  %v795_v24 = vld [vmem:[#allocation8 + $0x18] sm:$0xff]  ;;  %v397_v25 = vld [vmem:[#allocation6 + $0x68] sm:$0xff]  ;;  %v796_v27 = vld [vmem:[#allocation8 + $0x20] sm:$0xff]  ;;  %p1953_p3 = scmp.lt.s32.totalorder %s2511_s12, %s1951_s15 }
  0x72   : > { %v1681_v26 = vpack.c.bf16 %v795_v24, %v794_v20  ;;  %v797_v28 = vld [vmem:[#allocation8 + $0x28] sm:$0xff]  ;;  %v1669_v29 = vpack.c.bf16 %v397_v25, %v396_v22  ;;  %v398_v31 = vld [vmem:[#allocation6 + $0x70] sm:$0xff]  ;;  %v399_v32 = vld [vmem:[#allocation6 + $0x78] sm:$0xff]  ;;  %p1949_p10 = pneg %p1948_p1 }
  0x73   : > { %1652 = vmatpush3.bf16.msra.mxu0 %v1649_v5  ;;  %1678 = vmatprep.subr.bf16.mxu1 %v1677_v23  ;;  %v1685_v30 = vpack.c.bf16 %v797_v28, %v796_v27  ;;  %v1673_v33 = vpack.c.bf16 %v399_v32, %v398_v31  ;;  %v353_v34 = vld [vmem:[%s2275_s25 + $0x8] sm:$0xff]  ;;  %v354_v35 = vld [vmem:[%s2275_s25 + $0x10] sm:$0xff]  ;;  %v355_v36 = vld [vmem:[%s2275_s25 + $0x18] sm:$0xff] }
  0x74   : > { %1654 = vmatprep.subr.bf16.mxu0 %v1653_v8  ;;  %1680 = vmatpush3.bf16.msra.mxu1 %v1677_v23  ;;  %v356_v37 = vld [vmem:[%s2275_s25 + $0x20] sm:$0xff]  ;;  %v357_v38 = vld [vmem:[%s2275_s25 + $0x28] sm:$0xff]  ;;  %v358_v39 = vld [vmem:[%s2275_s25 + $0x30] sm:$0xff] }
  0x75   : > { %1682 = vmatprep.subr.bf16.mxu1 %v1681_v26  ;;  %v359_v40 = vld [vmem:[%s2275_s25 + $0x38] sm:$0xff]  ;;  %v360_v41 = vld [vmem:[%s2275_s25 + $0x40] sm:$0xff]  ;;  %v361_v42 = vld [vmem:[%s2275_s25 + $0x48] sm:$0xff] }
  0x76   : > { %v362_v43 = vld [vmem:[%s2275_s25 + $0x50] sm:$0xff]  ;;  %v363_v44 = vld [vmem:[%s2275_s25 + $0x58] sm:$0xff]  ;;  %v364_v45 = vld [vmem:[%s2275_s25 + $0x60] sm:$0xff] }
  0x77   : > { %1656 = vmatpush3.bf16.msra.mxu0 %v1653_v8  ;;  %v365_v46 = vld [vmem:[%s2275_s25 + $0x68] sm:$0xff]  ;;  %v366_v47 = vld [vmem:[%s2275_s25 + $0x70] sm:$0xff]  ;;  %v367_v48 = vld [vmem:[%s2275_s25 + $0x78] sm:$0xff] }
  0x78   : > { %1658 = vmatprep.subr.bf16.mxu0 %v1657_v12  ;;  %1684 = vmatpush3.bf16.msra.mxu1 %v1681_v26  ;;  %v368_v49 = vld [vmem:[%s2275_s25 + $0x80] sm:$0xff]  ;;  %v369_v50 = vld [vmem:[%s2275_s25 + $0x88] sm:$0xff]  ;;  %v370_v51 = vld [vmem:[%s2275_s25 + $0x90] sm:$0xff] }
  0x79   : > { %1686 = vmatprep.subr.bf16.mxu1 %v1685_v30  ;;  %v371_v52 = vld [vmem:[%s2275_s25 + $0x98] sm:$0xff]  ;;  %v372_v53 = vld [vmem:[%s2275_s25 + $0xa0] sm:$0xff]  ;;  %v373_v54 = vld [vmem:[%s2275_s25 + $0xa8] sm:$0xff] }
  0x7a   : > { %v374_v55 = vld [vmem:[%s2275_s25 + $0xb0] sm:$0xff]  ;;  %v375_v56 = vld [vmem:[%s2275_s25 + $0xb8] sm:$0xff]  ;;  %v376_v57 = vld [vmem:[%s2275_s25 + $0xc0] sm:$0xff] }
  0x7b   : > { %1660 = vmatpush3.bf16.msra.mxu0 %v1657_v12  ;;  %v377_v58 = vld [vmem:[%s2275_s25 + $0xc8] sm:$0xff]  ;;  %v378_v59 = vld [vmem:[%s2275_s25 + $0xd0] sm:$0xff]  ;;  %v379_v60 = vld [vmem:[%s2275_s25 + $0xd8] sm:$0xff] }
  0x7c   : > { %1662 = vmatprep.subr.bf16.mxu0 %v1661_v15  ;;  %1688 = vmatpush3.bf16.msra.mxu1 %v1685_v30  ;;  %v380_v61 = vld [vmem:[%s2275_s25 + $0xe0] sm:$0xff]  ;;  %v381_v62 = vld [vmem:[%s2275_s25 + $0xe8] sm:$0xff]  ;;  %v382_v63 = vld [vmem:[%s2275_s25 + $0xf0] sm:$0xff] }
  0x7d   : > { %v383_v0 = vld [vmem:[%s2275_s25 + $0xf8] sm:$0xff]  ;;  %v798_v1 = vld [vmem:[#allocation8 + $0x30] sm:$0xff]  ;;  %v800_v4 = vld [vmem:[#allocation8 + $0x40] sm:$0xff]  ;;  %s1952_s25 = scalar_lea.vmem %s1951_s15, 8192 }
  0x7e   : > { %v799_v2 = vld [vmem:[#allocation8 + $0x38] sm:$0xff]  ;;  %v801_v5 = vld [vmem:[#allocation8 + $0x48] sm:$0xff]  ;;  %v802_v7 = vld [vmem:[#allocation8 + $0x50] sm:$0xff]  ;;  %p1954_p5 = scmp.lt.s32.totalorder %s1952_s25, %s1946_s14 }
  0x7f   : > { %1664 = vmatpush3.bf16.msra.mxu0 %v1661_v15  ;;  %v1689_v3 = vpack.c.bf16 %v799_v2, %v798_v1  ;;  %v1693_v6 = vpack.c.bf16 %v801_v5, %v800_v4  ;;  %v803_v8 = vld [vmem:[#allocation8 + $0x58] sm:$0xff]  ;;  %v804_v10 = vld [vmem:[#allocation8 + $0x60] sm:$0xff]  ;;  %v805_v11 = vld [vmem:[#allocation8 + $0x68] sm:$0xff] }
  0x80   : > { %1666 = vmatprep.subr.bf16.mxu0 %v1665_v21  ;;  %v1697_v9 = vpack.c.bf16 %v803_v8, %v802_v7  ;;  %v1701_v12 = vpack.c.bf16 %v805_v11, %v804_v10  ;;  %v806_v13 = vld [vmem:[#allocation8 + $0x70] sm:$0xff]  ;;  %v807_v14 = vld [vmem:[#allocation8 + $0x78] sm:$0xff]  ;;  %v2320_v16 = vld [vmem:[%s2565_s2] ss:$0 sm:$0xff]  ;;  %p1955_p9 = por %p1954_p5, %p1953_p3 }
  0x81   : > { %1690 = vmatprep.subr.bf16.mxu1 %v1689_v3  ;;  %v1705_v15 = vpack.c.bf16 %v807_v14, %v806_v13 }
  0x82   : > { %1692 = vmatpush3.bf16.msra.mxu1 %v1689_v3  ;;  %p1956_p11 = pnand %p1955_p9, %p1949_p10 }
  0x83   : > { %1668 = vmatpush3.bf16.msra.mxu0 %v1665_v21  ;;  %1694 = vmatprep.subr.bf16.mxu1 %v1693_v6 }
  0x84   : > { %1670 = vmatprep.subr.bf16.mxu0 %v1669_v29 }
  0x86   : > { %1696 = vmatpush3.bf16.msra.mxu1 %v1693_v6 }
  0x87   : > { %1672 = vmatpush3.bf16.msra.mxu0 %v1669_v29  ;;  %1698 = vmatprep.subr.bf16.mxu1 %v1697_v9 }
  0x88   : > { %1674 = vmatprep.subr.bf16.mxu0 %v1673_v33 }
  0x8a   : > { %1700 = vmatpush3.bf16.msra.mxu1 %v1697_v9 }
  0x8b   : > { %1676 = vmatpush3.bf16.msra.mxu0 %v1673_v33  ;;  %1702 = vmatprep.subr.bf16.mxu1 %v1701_v12 }
  0x8e   : > { %1518 = vmatmul.mubr.f32.vlgmr.msra.gmra.mrb[0].mxu0 %v353_v34  ;;  %1704 = vmatpush3.bf16.msra.mxu1 %v1701_v12 }
  0x8f   : > { %1520 = vmatprep.mubr.f32.mxu0 %v354_v35  ;;  %1706 = vmatprep.subr.bf16.mxu1 %v1705_v15 }
  0x92   : > { %1521 = vmatmul.mubr.f32.gmra.mrb[2].mxu0 %v355_v36  ;;  %1708 = vmatpush3.bf16.msra.mxu1 %v1705_v15 }
  0x93   : > { %1523 = vmatprep.mubr.f32.mxu0 %v356_v37 }
  0x96   : > { %1524 = vmatmul.mubr.f32.gmra.mrb[4].mxu0 %v357_v38 }
  0x97   : > { %1526 = vmatprep.mubr.f32.mxu0 %v358_v39 }
  0x9a   : > { %1527 = vmatmul.mubr.f32.gmra.mrb[6].mxu0 %v359_v40 }
  0x9b   : > { %1529 = vmatprep.mubr.f32.mxu0 %v360_v41 }
  0x9e   : > { %1530 = vmatmul.mubr.f32.gmra.mrb[8].mxu0 %v361_v42 }
  0x9f   : > { %1532 = vmatprep.mubr.f32.mxu0 %v362_v43 }
  0xa2   : > { %1533 = vmatmul.mubr.f32.gmra.mrb[10].mxu0 %v363_v44 }
  0xa3   : > { %1535 = vmatprep.mubr.f32.mxu0 %v364_v45 }
  0xa6   : > { %1536 = vmatmul.mubr.f32.gmra.mrb[12].mxu0 %v365_v46 }
  0xa7   : > { %1538 = vmatprep.mubr.f32.mxu0 %v366_v47 }
  0xaa   : > { %1539 = vmatmul.mubr.f32.gmra.mrb[14].mxu0 %v367_v48 }
  0xab   : > { %1541 = vmatprep.mubr.f32.mxu0 %v368_v49 }
  0xae   : > { %1542 = vmatmul.mubr.f32.gmra.mrb[16].mxu0 %v369_v50 }
  0xaf   : > { %1544 = vmatprep.mubr.f32.mxu0 %v370_v51 }
  0xb2   : > { %1545 = vmatmul.mubr.f32.gmra.mrb[18].mxu0 %v371_v52 }
  0xb3   : > { %1547 = vmatprep.mubr.f32.mxu0 %v372_v53 }
  0xb6   : > { %1548 = vmatmul.mubr.f32.gmra.mrb[20].mxu0 %v373_v54 }
  0xb7   : > { %1550 = vmatprep.mubr.f32.mxu0 %v374_v55 }
  0xba   : > { %1551 = vmatmul.mubr.f32.gmra.mrb[22].mxu0 %v375_v56 }
  0xbb   : > { %1553 = vmatprep.mubr.f32.mxu0 %v376_v57 }
  0xbe   : > { %1554 = vmatmul.mubr.f32.gmra.mrb[24].mxu0 %v377_v58 }
  0xbf   : > { %1556 = vmatprep.mubr.f32.mxu0 %v378_v59 }
  0xc2   : > { %1557 = vmatmul.mubr.f32.gmra.mrb[26].mxu0 %v379_v60 }
  0xc3   : > { %1559 = vmatprep.mubr.f32.mxu0 %v380_v61 }
  0xc6   : > { %1560 = vmatmul.mubr.f32.gmra.mrb[28].mxu0 %v381_v62 }
  0xc7   : > { %1562 = vmatprep.mubr.f32.mxu0 %v382_v63 }
  0xca   : > { %1563 = vmatmul.mubr.f32.gmra.mrb[30].mxu0 %v383_v0 }
 0x161   : > { %v1519_v17 = vpop.f32.mrb[0].mxu0 }
 0x162   : > { %v479_v18 = vadd.f32 %v1519_v17, %v2320_v16  ;;  %v473_v19 = vpop.f32.mrb[1].mxu0 }
 0x163   : > { %v474_v20 = vadd.f32 %v2320_v16, %v473_v19 }
 0x164   : > { %v665_v21 = vmul.f32 0.70710677, %v479_v18  ;;  %v633_v49 = vmul.f32 0.5, %v479_v18 }
 0x165   : > { %v664_v22 = vmul.f32 0.70710677, %v474_v20  ;;  %v1522_v23 = vpop.f32.mrb[2].mxu0  ;;  %v632_v47 = vmul.f32 0.5, %v474_v20 }
 0x166   : > { %1796 = verf.f32 %v665_v21  ;;  %v489_v24 = vadd.f32 %v1522_v23, %v2320_v16  ;;  %v483_v25 = vpop.f32.mrb[3].mxu0 }
 0x167   : > { %1798 = verf.f32 %v664_v22  ;;  %v484_v26 = vadd.f32 %v2320_v16, %v483_v25 }
 0x168   : > { %v667_v27 = vmul.f32 0.70710677, %v489_v24  ;;  %v635_v63 = vmul.f32 0.5, %v489_v24 }
 0x169   : > { %v666_v28 = vmul.f32 0.70710677, %v484_v26  ;;  %v1525_v29 = vpop.f32.mrb[4].mxu0  ;;  %v634_v59 = vmul.f32 0.5, %v484_v26 }
 0x16a   : > { %1800 = verf.f32 %v667_v27  ;;  %v499_v30 = vadd.f32 %v1525_v29, %v2320_v16  ;;  %v493_v31 = vpop.f32.mrb[5].mxu0 }
 0x16b   : > { %1802 = verf.f32 %v666_v28  ;;  %v494_v32 = vadd.f32 %v2320_v16, %v493_v31 }
 0x16c   : > { %v669_v33 = vmul.f32 0.70710677, %v499_v30  ;;  %v637_v13 = vmul.f32 0.5, %v499_v30 }
 0x16d   : > { %v668_v34 = vmul.f32 0.70710677, %v494_v32  ;;  %v1528_v35 = vpop.f32.mrb[6].mxu0  ;;  %v636_v9 = vmul.f32 0.5, %v494_v32 }
 0x16e   : > { %1804 = verf.f32 %v669_v33  ;;  %v2329_v36 = vadd.f32 %v1528_v35, %v2320_v16  ;;  %v503_v37 = vpop.f32.mrb[7].mxu0 }
 0x16f   : > { %1806 = verf.f32 %v668_v34  ;;  %v504_v38 = vadd.f32 %v2320_v16, %v503_v37 }
 0x170   : > { %v1797_v39 = vpop.eup %1796  ;;  %v671_v40 = vmul.f32 0.70710677, %v2329_v36  ;;  %v639_v28 = vmul.f32 0.5, %v2329_v36 }
 0x171   : > { %v1799_v41 = vpop.eup %1798  ;;  %v729_v42 = vadd.f32 1.0, %v1797_v39  ;;  %v670_v43 = vmul.f32 0.70710677, %v504_v38  ;;  %v1531_v44 = vpop.f32.mrb[8].mxu0  ;;  %v638_v24 = vmul.f32 0.5, %v504_v38 }
 0x172   : > { %1808 = verf.f32 %v671_v40  ;;  %v2334_v45 = vadd.f32 %v1531_v44, %v2320_v16  ;;  %v513_v46 = vpop.f32.mrb[9].mxu0  ;;  %v728_v48 = vadd.f32 1.0, %v1799_v41 }
 0x173   : > { %1810 = verf.f32 %v670_v43  ;;  %v2337_v50 = vadd.f32 %v2320_v16, %v513_v46  ;;  %v761_v58 = vmul.f32 %v729_v42, %v633_v49 }
 0x174   : > { %v1801_v51 = vpop.eup %1800  ;;  %v673_v52 = vmul.f32 0.70710677, %v2334_v45  ;;  %v760_v53 = vmul.f32 %v728_v48, %v632_v47  ;;  %v641_v42 = vmul.f32 0.5, %v2334_v45 }
 0x175   : > { %v1803_v54 = vpop.eup %1802  ;;  %v731_v55 = vadd.f32 1.0, %v1801_v51  ;;  %v672_v56 = vmul.f32 0.70710677, %v2337_v50  ;;  %v1534_v57 = vpop.f32.mrb[10].mxu0  ;;  %v640_v39 = vmul.f32 0.5, %v2337_v50 }
 0x176   : > { %v730_v60 = vadd.f32 1.0, %v1803_v54  ;;  %1812 = verf.f32 %v673_v52  ;;  %v2342_v61 = vadd.f32 %v1534_v57, %v2320_v16  ;;  %v523_v62 = vpop.f32.mrb[11].mxu0  ;;  %1597 = vmatprep.mubr.f32.mxu1 %v760_v53 }
 0x177   : > { %1814 = verf.f32 %v672_v56  ;;  %v2345_v0 = vadd.f32 %v2320_v16, %v523_v62  ;;  %1598 = vmatmul.mubr.f32.vlgmr.msra.gmra.mrb[0].mxu1 %v761_v58  ;;  %v763_v8 = vmul.f32 %v731_v55, %v635_v63 }
 0x178   : > { %v1805_v1 = vpop.eup %1804  ;;  %v675_v2 = vmul.f32 0.70710677, %v2342_v61  ;;  %v762_v3 = vmul.f32 %v730_v60, %v634_v59  ;;  %v643_v56 = vmul.f32 0.5, %v2342_v61 }
 0x179   : > { %v1807_v4 = vpop.eup %1806  ;;  %v733_v5 = vadd.f32 1.0, %v1805_v1  ;;  %v674_v6 = vmul.f32 0.70710677, %v2345_v0  ;;  %v1537_v7 = vpop.f32.mrb[12].mxu0  ;;  %v642_v53 = vmul.f32 0.5, %v2345_v0 }
 0x17a   : > { %v732_v10 = vadd.f32 1.0, %v1807_v4  ;;  %1816 = verf.f32 %v675_v2  ;;  %v2350_v11 = vadd.f32 %v1537_v7, %v2320_v16  ;;  %v533_v12 = vpop.f32.mrb[13].mxu0  ;;  %1600 = vmatprep.mubr.f32.mxu1 %v762_v3 }
 0x17b   : > { %1818 = verf.f32 %v674_v6  ;;  %v2353_v14 = vadd.f32 %v2320_v16, %v533_v12  ;;  %1601 = vmatmul.mubr.f32.gmra.mrb[2].mxu1 %v763_v8  ;;  %v765_v23 = vmul.f32 %v733_v5, %v637_v13 }
 0x17c   : > { %v1809_v15 = vpop.eup %1808  ;;  %v677_v17 = vmul.f32 0.70710677, %v2350_v11  ;;  %v764_v18 = vmul.f32 %v732_v10, %v636_v9  ;;  %v645_v6 = vmul.f32 0.5, %v2350_v11 }
 0x17d   : > { %v1811_v19 = vpop.eup %1810  ;;  %v735_v20 = vadd.f32 1.0, %v1809_v15  ;;  %v676_v21 = vmul.f32 0.70710677, %v2353_v14  ;;  %v1540_v22 = vpop.f32.mrb[14].mxu0  ;;  %v644_v3 = vmul.f32 0.5, %v2353_v14 }
 0x17e   : > { %v734_v25 = vadd.f32 1.0, %v1811_v19  ;;  %1820 = verf.f32 %v677_v17  ;;  %v2358_v26 = vadd.f32 %v1540_v22, %v2320_v16  ;;  %v543_v27 = vpop.f32.mrb[15].mxu0  ;;  %1603 = vmatprep.mubr.f32.mxu1 %v764_v18 }
 0x17f   : > { %1822 = verf.f32 %v676_v21  ;;  %v2362_v29 = vadd.f32 %v2320_v16, %v543_v27  ;;  %1604 = vmatmul.mubr.f32.gmra.mrb[4].mxu1 %v765_v23  ;;  %v767_v38 = vmul.f32 %v735_v20, %v639_v28 }
 0x180   : > { %v1813_v30 = vpop.eup %1812  ;;  %v679_v31 = vmul.f32 0.70710677, %v2358_v26  ;;  %v766_v32 = vmul.f32 %v734_v25, %v638_v24  ;;  %v647_v21 = vmul.f32 0.5, %v2358_v26 }
 0x181   : > { %v1815_v33 = vpop.eup %1814  ;;  %v737_v34 = vadd.f32 1.0, %v1813_v30  ;;  %v678_v35 = vmul.f32 0.70710677, %v2362_v29  ;;  %v1543_v37 = vpop.f32.mrb[16].mxu0  ;;  %v646_v18 = vmul.f32 0.5, %v2362_v29 }
 0x182   : > { %v736_v40 = vadd.f32 1.0, %v1815_v33  ;;  %1824 = verf.f32 %v679_v31  ;;  %v2368_v36 = vadd.f32 %v1543_v37, %v2320_v16  ;;  %v553_v41 = vpop.f32.mrb[17].mxu0  ;;  %1606 = vmatprep.mubr.f32.mxu1 %v766_v32 }
 0x183   : > { %1826 = verf.f32 %v678_v35  ;;  %v2372_v43 = vadd.f32 %v2320_v16, %v553_v41  ;;  %1607 = vmatmul.mubr.f32.gmra.mrb[6].mxu1 %v767_v38  ;;  %v769_v52 = vmul.f32 %v737_v34, %v641_v42 }
 0x184   : > { %v1817_v44 = vpop.eup %1816  ;;  %v681_v46 = vmul.f32 0.70710677, %v2368_v36  ;;  %v768_v47 = vmul.f32 %v736_v40, %v640_v39  ;;  %v649_v35 = vmul.f32 0.5, %v2368_v36 }
 0x185   : > { %v1819_v48 = vpop.eup %1818  ;;  %v739_v49 = vadd.f32 1.0, %v1817_v44  ;;  %v680_v50 = vmul.f32 0.70710677, %v2372_v43  ;;  %v1546_v51 = vpop.f32.mrb[18].mxu0  ;;  %v648_v32 = vmul.f32 0.5, %v2372_v43 }
 0x186   : > { %v738_v54 = vadd.f32 1.0, %v1819_v48  ;;  %1828 = verf.f32 %v681_v46  ;;  %v2378_v45 = vadd.f32 %v1546_v51, %v2320_v16  ;;  %v563_v55 = vpop.f32.mrb[19].mxu0  ;;  %1609 = vmatprep.mubr.f32.mxu1 %v768_v47 }
 0x187   : > { %1830 = verf.f32 %v680_v50  ;;  %v2382_v57 = vadd.f32 %v2320_v16, %v563_v55  ;;  %1610 = vmatmul.mubr.f32.gmra.mrb[8].mxu1 %v769_v52  ;;  %v771_v2 = vmul.f32 %v739_v49, %v643_v56 }
 0x188   : > { %v1821_v58 = vpop.eup %1820  ;;  %v683_v59 = vmul.f32 0.70710677, %v2378_v45  ;;  %v770_v60 = vmul.f32 %v738_v54, %v642_v53  ;;  %v651_v50 = vmul.f32 0.5, %v2378_v45 }
 0x189   : > { %v1823_v62 = vpop.eup %1822  ;;  %v741_v63 = vadd.f32 1.0, %v1821_v58  ;;  %v682_v0 = vmul.f32 0.70710677, %v2382_v57  ;;  %v1549_v1 = vpop.f32.mrb[20].mxu0  ;;  %v650_v47 = vmul.f32 0.5, %v2382_v57 }
 0x18a   : > { %v740_v4 = vadd.f32 1.0, %v1823_v62  ;;  %1832 = verf.f32 %v683_v59  ;;  %v2388_v61 = vadd.f32 %v1549_v1, %v2320_v16  ;;  %v573_v5 = vpop.f32.mrb[21].mxu0  ;;  %1612 = vmatprep.mubr.f32.mxu1 %v770_v60 }
 0x18b   : > { %1834 = verf.f32 %v682_v0  ;;  %v2392_v7 = vadd.f32 %v2320_v16, %v573_v5  ;;  %1613 = vmatmul.mubr.f32.gmra.mrb[10].mxu1 %v771_v2  ;;  %v773_v17 = vmul.f32 %v741_v63, %v645_v6 }
 0x18c   : > { %v1825_v8 = vpop.eup %1824  ;;  %v685_v9 = vmul.f32 0.70710677, %v2388_v61  ;;  %v772_v10 = vmul.f32 %v740_v4, %v644_v3  ;;  %v653_v0 = vmul.f32 0.5, %v2388_v61 }
 0x18d   : > { %v1827_v12 = vpop.eup %1826  ;;  %v743_v13 = vadd.f32 1.0, %v1825_v8  ;;  %v684_v14 = vmul.f32 0.70710677, %v2392_v7  ;;  %v1552_v15 = vpop.f32.mrb[22].mxu0  ;;  %v652_v60 = vmul.f32 0.5, %v2392_v7 }
 0x18e   : > { %v742_v19 = vadd.f32 1.0, %v1827_v12  ;;  %1836 = verf.f32 %v685_v9  ;;  %v2398_v11 = vadd.f32 %v1552_v15, %v2320_v16  ;;  %v583_v20 = vpop.f32.mrb[23].mxu0  ;;  %1615 = vmatprep.mubr.f32.mxu1 %v772_v10 }
 0x18f   : > { %1838 = verf.f32 %v684_v14  ;;  %v2402_v22 = vadd.f32 %v2320_v16, %v583_v20  ;;  %1616 = vmatmul.mubr.f32.gmra.mrb[12].mxu1 %v773_v17  ;;  %v775_v31 = vmul.f32 %v743_v13, %v647_v21 }
 0x190   : > { %v1829_v23 = vpop.eup %1828  ;;  %v687_v24 = vmul.f32 0.70710677, %v2398_v11  ;;  %v774_v25 = vmul.f32 %v742_v19, %v646_v18  ;;  %v655_v61 = vmul.f32 0.5, %v2398_v11 }
 0x191   : > { %v1831_v27 = vpop.eup %1830  ;;  %v745_v28 = vadd.f32 1.0, %v1829_v23  ;;  %v686_v29 = vmul.f32 0.70710677, %v2402_v22  ;;  %v1555_v30 = vpop.f32.mrb[24].mxu0  ;;  %v654_v10 = vmul.f32 0.5, %v2402_v22 }
 0x192   : > { %v744_v33 = vadd.f32 1.0, %v1831_v27  ;;  %1840 = verf.f32 %v687_v24  ;;  %v2408_v26 = vadd.f32 %v1555_v30, %v2320_v16  ;;  %v593_v34 = vpop.f32.mrb[25].mxu0  ;;  %1618 = vmatprep.mubr.f32.mxu1 %v774_v25 }
 0x193   : > { %1842 = verf.f32 %v686_v29  ;;  %v2412_v37 = vadd.f32 %v2320_v16, %v593_v34  ;;  %1619 = vmatmul.mubr.f32.gmra.mrb[14].mxu1 %v775_v31  ;;  %v777_v46 = vmul.f32 %v745_v28, %v649_v35 }
 0x194   : > { %v1833_v38 = vpop.eup %1832  ;;  %v689_v39 = vmul.f32 0.70710677, %v2408_v26  ;;  %v776_v40 = vmul.f32 %v744_v33, %v648_v32  ;;  %v657_v27 = vmul.f32 0.5, %v2408_v26 }
 0x195   : > { %v1835_v41 = vpop.eup %1834  ;;  %v747_v42 = vadd.f32 1.0, %v1833_v38  ;;  %v688_v43 = vmul.f32 0.70710677, %v2412_v37  ;;  %v1558_v44 = vpop.f32.mrb[26].mxu0  ;;  %v656_v22 = vmul.f32 0.5, %v2412_v37 }
 0x196   : > { %v746_v48 = vadd.f32 1.0, %v1835_v41  ;;  %1844 = verf.f32 %v689_v39  ;;  %v2418_v36 = vadd.f32 %v1558_v44, %v2320_v16  ;;  %v603_v49 = vpop.f32.mrb[27].mxu0  ;;  %1621 = vmatprep.mubr.f32.mxu1 %v776_v40 }
 0x197   : > { %1846 = verf.f32 %v688_v43  ;;  %v604_v51 = vadd.f32 %v2320_v16, %v603_v49  ;;  %1622 = vmatmul.mubr.f32.gmra.mrb[16].mxu1 %v777_v46  ;;  %v779_v59 = vmul.f32 %v747_v42, %v651_v50 }
 0x198   : > { %v1837_v52 = vpop.eup %1836  ;;  %v691_v53 = vmul.f32 0.70710677, %v2418_v36  ;;  %v778_v54 = vmul.f32 %v746_v48, %v650_v47  ;;  %v659_v33 = vmul.f32 0.5, %v2418_v36 }
 0x199   : > { %v1839_v55 = vpop.eup %1838  ;;  %v749_v56 = vadd.f32 1.0, %v1837_v52  ;;  %v690_v57 = vmul.f32 0.70710677, %v604_v51  ;;  %v1561_v58 = vpop.f32.mrb[28].mxu0  ;;  %v658_v31 = vmul.f32 0.5, %v604_v51 }
 0x19a   : > { %v748_v62 = vadd.f32 1.0, %v1839_v55  ;;  %1848 = verf.f32 %v691_v53  ;;  %v619_v63 = vadd.f32 %v1561_v58, %v2320_v16  ;;  %v613_v45 = vpop.f32.mrb[29].mxu0  ;;  %1624 = vmatprep.mubr.f32.mxu1 %v778_v54  ;;  %v2437_v52 = vld [vmem:[%s2567_s4] ss:$0 sm:$0xff] }
 0x19b   : > { %1850 = verf.f32 %v690_v57  ;;  %v614_v1 = vadd.f32 %v2320_v16, %v613_v45  ;;  %1625 = vmatmul.mubr.f32.gmra.mrb[18].mxu1 %v779_v59  ;;  %v781_v7 = vmul.f32 %v749_v56, %v653_v0 }
 0x19c   : > { %v1841_v2 = vpop.eup %1840  ;;  %v693_v3 = vmul.f32 0.70710677, %v619_v63  ;;  %v780_v4 = vmul.f32 %v748_v62, %v652_v60  ;;  %v661_v41 = vmul.f32 0.5, %v619_v63 }
 0x19d   : > { %v1843_v5 = vpop.eup %1842  ;;  %v751_v6 = vadd.f32 1.0, %v1841_v2  ;;  %v692_v8 = vmul.f32 0.70710677, %v614_v1  ;;  %v1564_v9 = vpop.f32.mrb[30].mxu0  ;;  %v660_v40 = vmul.f32 0.5, %v614_v1 }
 0x19e   : > { %v750_v12 = vadd.f32 1.0, %v1843_v5  ;;  %1852 = verf.f32 %v693_v3  ;;  %v629_v13 = vadd.f32 %v1564_v9, %v2320_v16  ;;  %v623_v14 = vpop.f32.mrb[31].mxu0  ;;  %1627 = vmatprep.mubr.f32.mxu1 %v780_v4 }
 0x19f   : > { %1854 = verf.f32 %v692_v8  ;;  %v624_v15 = vadd.f32 %v2320_v16, %v623_v14  ;;  %1628 = vmatmul.mubr.f32.gmra.mrb[20].mxu1 %v781_v7  ;;  %v783_v24 = vmul.f32 %v751_v6, %v655_v61 }
 0x1a0   : > { %v1845_v17 = vpop.eup %1844  ;;  %v695_v18 = vmul.f32 0.70710677, %v629_v13  ;;  %v782_v19 = vmul.f32 %v750_v12, %v654_v10  ;;  %v663_v36 = vmul.f32 0.5, %v629_v13 }
 0x1a1   : > { %v1847_v20 = vpop.eup %1846  ;;  %v753_v21 = vadd.f32 1.0, %v1845_v17  ;;  %v694_v23 = vmul.f32 0.70710677, %v624_v15  ;;  %v662_v48 = vmul.f32 0.5, %v624_v15 }
 0x1a2   : > { %v752_v25 = vadd.f32 1.0, %v1847_v20  ;;  %1856 = verf.f32 %v695_v18  ;;  %1630 = vmatprep.mubr.f32.mxu1 %v782_v19 }
 0x1a3   : > { %1858 = verf.f32 %v694_v23  ;;  %1631 = vmatmul.mubr.f32.gmra.mrb[22].mxu1 %v783_v24  ;;  %v785_v30 = vmul.f32 %v753_v21, %v657_v27 }
 0x1a4   : > { %v1849_v11 = vpop.eup %1848  ;;  %v784_v28 = vmul.f32 %v752_v25, %v656_v22 }
 0x1a5   : > { %v1851_v16 = vpop.eup %1850  ;;  %v755_v29 = vadd.f32 1.0, %v1849_v11 }
 0x1a6   : > { %v754_v32 = vadd.f32 1.0, %v1851_v16  ;;  %1633 = vmatprep.mubr.f32.mxu1 %v784_v28 }
 0x1a7   : > { %1634 = vmatmul.mubr.f32.gmra.mrb[24].mxu1 %v785_v30  ;;  %v787_v39 = vmul.f32 %v755_v29, %v659_v33 }
 0x1a8   : > { %v1853_v34 = vpop.eup %1852  ;;  %v786_v35 = vmul.f32 %v754_v32, %v658_v31 }
 0x1a9   : > { %v1855_v37 = vpop.eup %1854  ;;  %v757_v38 = vadd.f32 1.0, %v1853_v34 }
 0x1aa   : > { %v756_v26 = vadd.f32 1.0, %v1855_v37  ;;  %1636 = vmatprep.mubr.f32.mxu1 %v786_v35 }
 0x1ab   : > { %1637 = vmatmul.mubr.f32.gmra.mrb[26].mxu1 %v787_v39  ;;  %v789_v47 = vmul.f32 %v757_v38, %v661_v41 }
 0x1ac   : > { %v1857_v42 = vpop.eup %1856  ;;  %v788_v43 = vmul.f32 %v756_v26, %v660_v40 }
 0x1ad   : > { %v1859_v44 = vpop.eup %1858  ;;  %v759_v46 = vadd.f32 1.0, %v1857_v42 }
 0x1ae   : > { %v758_v49 = vadd.f32 1.0, %v1859_v44  ;;  %1639 = vmatprep.mubr.f32.mxu1 %v788_v43 }
 0x1af   : > { %1640 = vmatmul.mubr.f32.gmra.mrb[28].mxu1 %v789_v47  ;;  %v791_v51 = vmul.f32 %v759_v46, %v663_v36 }
 0x1b0   : > { %v790_v50 = vmul.f32 %v758_v49, %v662_v48 }
 0x1b2   : > { %1642 = vmatprep.mubr.f32.mxu1 %v790_v50 }
 0x1b3   : > { %1643 = vmatmul.mubr.f32.gmra.mrb[30].mxu1 %v791_v51 }
 0x24a   : > { %v1599_v53 = vpop.f32.mrb[0].mxu1 }
 0x24b   : > { %v1172_v54 = vadd.f32 %v1599_v53, %v2437_v52  ;;  %v906_v55 = vpop.f32.mrb[1].mxu1 }
 0x24c   : > { %v1171_v56 = vadd.f32 %v2437_v52, %v906_v55 }
 0x24d   : > { %1204 = vst [vmem:[%s2443_s9 + $0x8] sm:$0xff] %v1172_v54 }
 0x24e   : > { %1203 = vst [vmem:[%s2443_s9] sm:$0xff] %v1171_v56  ;;  %v1602_v57 = vpop.f32.mrb[2].mxu1 }
 0x24f   : > { %v1174_v58 = vadd.f32 %v1602_v57, %v2437_v52  ;;  %v916_v59 = vpop.f32.mrb[3].mxu1 }
 0x250   : > { %v1173_v60 = vadd.f32 %v2437_v52, %v916_v59 }
 0x251   : > { %1206 = vst [vmem:[%s2443_s9 + $0x18] sm:$0xff] %v1174_v58 }
 0x252   : > { %1205 = vst [vmem:[%s2443_s9 + $0x10] sm:$0xff] %v1173_v60  ;;  %v1605_v62 = vpop.f32.mrb[4].mxu1 }
 0x253   : > { %v1176_v63 = vadd.f32 %v1605_v62, %v2437_v52  ;;  %v926_v45 = vpop.f32.mrb[5].mxu1 }
 0x254   : > { %v1175_v0 = vadd.f32 %v2437_v52, %v926_v45 }
 0x255   : > { %1208 = vst [vmem:[%s2443_s9 + $0x28] sm:$0xff] %v1176_v63 }
 0x256   : > { %1207 = vst [vmem:[%s2443_s9 + $0x20] sm:$0xff] %v1175_v0  ;;  %v1608_v1 = vpop.f32.mrb[6].mxu1 }
 0x257   : > { %v1178_v2 = vadd.f32 %v1608_v1, %v2437_v52  ;;  %v936_v3 = vpop.f32.mrb[7].mxu1 }
 0x258   : > { %v1177_v4 = vadd.f32 %v2437_v52, %v936_v3 }
 0x259   : > { %1210 = vst [vmem:[%s2443_s9 + $0x38] sm:$0xff] %v1178_v2 }
 0x25a   : > { %1209 = vst [vmem:[%s2443_s9 + $0x30] sm:$0xff] %v1177_v4  ;;  %v1611_v5 = vpop.f32.mrb[8].mxu1 }
 0x25b   : > { %v1180_v6 = vadd.f32 %v1611_v5, %v2437_v52  ;;  %v946_v8 = vpop.f32.mrb[9].mxu1 }
 0x25c   : > { %v1179_v9 = vadd.f32 %v2437_v52, %v946_v8 }
 0x25d   : > { %1212 = vst [vmem:[%s2443_s9 + $0x48] sm:$0xff] %v1180_v6 }
 0x25e   : > { %1211 = vst [vmem:[%s2443_s9 + $0x40] sm:$0xff] %v1179_v9  ;;  %v1614_v7 = vpop.f32.mrb[10].mxu1 }
 0x25f   : > { %v1182_v10 = vadd.f32 %v1614_v7, %v2437_v52  ;;  %v956_v12 = vpop.f32.mrb[11].mxu1 }
 0x260   : > { %v1181_v13 = vadd.f32 %v2437_v52, %v956_v12 }
 0x261   : > { %1214 = vst [vmem:[%s2443_s9 + $0x58] sm:$0xff] %v1182_v10 }
 0x262   : > { %1213 = vst [vmem:[%s2443_s9 + $0x50] sm:$0xff] %v1181_v13  ;;  %v1617_v14 = vpop.f32.mrb[12].mxu1 }
 0x263   : > { %v1184_v61 = vadd.f32 %v1617_v14, %v2437_v52  ;;  %v966_v15 = vpop.f32.mrb[13].mxu1 }
 0x264   : > { %v1183_v17 = vadd.f32 %v2437_v52, %v966_v15 }
 0x265   : > { %1216 = vst [vmem:[%s2443_s9 + $0x68] sm:$0xff] %v1184_v61 }
 0x266   : > { %1215 = vst [vmem:[%s2443_s9 + $0x60] sm:$0xff] %v1183_v17  ;;  %v1620_v18 = vpop.f32.mrb[14].mxu1 }
 0x267   : > { %v1186_v19 = vadd.f32 %v1620_v18, %v2437_v52  ;;  %v976_v20 = vpop.f32.mrb[15].mxu1 }
 0x268   : > { %v1185_v21 = vadd.f32 %v2437_v52, %v976_v20 }
 0x269   : > { %1218 = vst [vmem:[%s2443_s9 + $0x78] sm:$0xff] %v1186_v19 }
 0x26a   : > { %1217 = vst [vmem:[%s2443_s9 + $0x70] sm:$0xff] %v1185_v21  ;;  %v1623_v23 = vpop.f32.mrb[16].mxu1 }
 0x26b   : > { %v1188_v24 = vadd.f32 %v1623_v23, %v2437_v52  ;;  %v986_v22 = vpop.f32.mrb[17].mxu1 }
 0x26c   : > { %v1187_v25 = vadd.f32 %v2437_v52, %v986_v22 }
 0x26d   : > { %1220 = vst [vmem:[%s2443_s9 + $0x88] sm:$0xff] %v1188_v24 }
 0x26e   : > { %1219 = vst [vmem:[%s2443_s9 + $0x80] sm:$0xff] %v1187_v25  ;;  %v1626_v27 = vpop.f32.mrb[18].mxu1 }
 0x26f   : > { %v1190_v11 = vadd.f32 %v1626_v27, %v2437_v52  ;;  %v996_v28 = vpop.f32.mrb[19].mxu1 }
 0x270   : > { %v1189_v16 = vadd.f32 %v2437_v52, %v996_v28 }
 0x271   : > { %1222 = vst [vmem:[%s2443_s9 + $0x98] sm:$0xff] %v1190_v11 }
 0x272   : > { %1221 = vst [vmem:[%s2443_s9 + $0x90] sm:$0xff] %v1189_v16  ;;  %v1629_v29 = vpop.f32.mrb[20].mxu1 }
 0x273   : > { %v1192_v30 = vadd.f32 %v1629_v29, %v2437_v52  ;;  %v1006_v31 = vpop.f32.mrb[21].mxu1 }
 0x274   : > { %v1191_v32 = vadd.f32 %v2437_v52, %v1006_v31 }
 0x275   : > { %1224 = vst [vmem:[%s2443_s9 + $0xa8] sm:$0xff] %v1192_v30 }
 0x276   : > { %1223 = vst [vmem:[%s2443_s9 + $0xa0] sm:$0xff] %v1191_v32  ;;  %v1632_v33 = vpop.f32.mrb[22].mxu1 }
 0x277   : > { %v1194_v34 = vadd.f32 %v1632_v33, %v2437_v52  ;;  %v1016_v35 = vpop.f32.mrb[23].mxu1 }
 0x278   : > { %v1193_v37 = vadd.f32 %v2437_v52, %v1016_v35 }
 0x279   : > { %1226 = vst [vmem:[%s2443_s9 + $0xb8] sm:$0xff] %v1194_v34 }
 0x27a   : > { %1225 = vst [vmem:[%s2443_s9 + $0xb0] sm:$0xff] %v1193_v37  ;;  %v1635_v38 = vpop.f32.mrb[24].mxu1 }
 0x27b   : > { %v1196_v39 = vadd.f32 %v1635_v38, %v2437_v52  ;;  %v1026_v40 = vpop.f32.mrb[25].mxu1 }
 0x27c   : > { %v1195_v26 = vadd.f32 %v2437_v52, %v1026_v40 }
 0x27d   : > { %1228 = vst [vmem:[%s2443_s9 + $0xc8] sm:$0xff] %v1196_v39 }
 0x27e   : > { %1227 = vst [vmem:[%s2443_s9 + $0xc0] sm:$0xff] %v1195_v26  ;;  %v1638_v41 = vpop.f32.mrb[26].mxu1 }
 0x27f   : > { %v1198_v42 = vadd.f32 %v1638_v41, %v2437_v52  ;;  %v1036_v43 = vpop.f32.mrb[27].mxu1 }
 0x280   : > { %v1197_v44 = vadd.f32 %v2437_v52, %v1036_v43 }
 0x281   : > { %1230 = vst [vmem:[%s2443_s9 + $0xd8] sm:$0xff] %v1198_v42 }
 0x282   : > { %1229 = vst [vmem:[%s2443_s9 + $0xd0] sm:$0xff] %v1197_v44  ;;  %v1641_v46 = vpop.f32.mrb[28].mxu1 }
 0x283   : > { %v1200_v47 = vadd.f32 %v1641_v46, %v2437_v52  ;;  %v1046_v48 = vpop.f32.mrb[29].mxu1 }
 0x284   : > { %v1199_v49 = vadd.f32 %v2437_v52, %v1046_v48 }
 0x285   : > { %1232 = vst [vmem:[%s2443_s9 + $0xe8] sm:$0xff] %v1200_v47 }
 0x286   : > { %1231 = vst [vmem:[%s2443_s9 + $0xe0] sm:$0xff] %v1199_v49  ;;  %v1644_v36 = vpop.f32.mrb[30].mxu1 }
 0x287   : > { %v1202_v50 = vadd.f32 %v1644_v36, %v2437_v52  ;;  %v1056_v51 = vpop.f32.mrb[31].mxu1 }
 0x288   : > { %v1201_v53 = vadd.f32 %v2437_v52, %v1056_v51 }
 0x289   : > { %1234 = vst [vmem:[%s2443_s9 + $0xf8] sm:$0xff] %v1202_v50 }
 0x28a   : > { %1233 = vst [vmem:[%s2443_s9 + $0xf0] sm:$0xff] %v1201_v53 }
 0x28b   : > { %1959 = shalt.err (!%p1956_p11)
}
 0x28c   : > { %s1960_s26 = scalar_lea.hbm %s2509_s7, 4096  ;;  %s1964_s6 = scalar_lea.hbm %s2568_s5, 8192 }
 0x28d   : > { %p1961_p0 = scmp.ne.s32.totalorder %s2509_s7, %s1960_s26  ;;  %p1965_p6 = scmp.lt.u32.totalorder %s2509_s7, %s2568_s5 }
 0x28e   : > { %p1966_p7 = scmp.lt.u32.totalorder %s1964_s6, %s1960_s26  ;;  %p1968_p8 = scmp.lt.u32.totalorder %s1960_s26, %s2509_s7 }
 0x28f   : > { %p1962_p4 = pnand %p1961_p0, %p2585_p12 }
 0x290   : > { %p1967_p2 = por %p1966_p7, %p1965_p6 }
 0x291   : > { %p1963_p13 = pneg %p1962_p4 }
 0x292   : > { %p1969_p1 = por %p1968_p8, %p1967_p2 }
 0x294   : > { %p1970_p10 = pnand %p1969_p1, %p1963_p13 }
 0x296   : > { %1973 = shalt.err (!%p1970_p10)
}
 0x297   : > { %s2040_s10 = smov 128   ;;  %s2041_s16 = smov 8  }
 0x298   : > { %1719 = dma.vmem_to_hbm [thread:$0]  (%p2585_p12), %s2511_s12, 4096, %s2509_s7, %s1236_s21, %s2040_s10, %s2040_s10, %s2041_s16  }
 0x299 PF: > { %s1264_s14 = sand.u32 1, %s2012_s18   ;;  %p2586_p3 = scmp.ne.s32.totalorder %s2577_s29, 0 }
 0x29a   : > { %p2587_p5 = scmp.ge.s32.totalorder %s2032_s23, 2  ;;  %s1265_s27 = scalar_lea.sflag [#allocation5], %s1264_s14 }
 0x29c   : > { %p1733_p9 = pnand %p2587_p5, %p2586_p3 }
 0x29e   : > { %2007 = dma.done.wait (!%p1733_p9), %s1265_s27, 4096  }
 0x29f   : > { %2009 = vsyncadd (!%p1733_p9), %s1265_s27, 4294963200  ;;  %s22_s23 = sadd.s32 1, %s2032_s23   ;;  %s2588_s18 = smov %s2016_s19 }
 0x2a0   : > { %p19_p11 = scmp.ge.s32.totalorder %s22_s23, 4   ;;  %s2589_s19 = smov %s2020_s20 }
 0x2a1   : > { %s2590_s20 = smov %s2220_s17  ;;  %s2591_s21 = smov %s2028_s22 }
 0x2a2   : > { %s2592_s22 = smov %s2594_s8  ;;  %21 = sbr.rel (!%p19_p11) target bundleno = 7 (0x7), region = 106 }
 0x2a9   :  { %1270 = vsyncpa [#allocation4], 1 }
 0x2aa   :  { %1272 = vsyncpa [#allocation4 + $0x1], 1 }
 0x2ab   :  { %1273 = vsyncpa [#allocation7], 1 }
 0x2ac   :  { %1274 = vsyncpa [#allocation5], 1 }
 0x2ad   :  { %1276 = vsyncpa [#allocation5 + $0x1], 1 }

</bundles_post_ra>
